<compile_context>
chip_gen: v6e
topology: v6e:2x2x1
jax: 0.10.0
libtpu: 0.0.40
codegen_flags: <defaults>
</compile_context>

<pallas_src>
import jax
import jax.numpy as jnp
from jax import lax
from jax.experimental import pallas as pl
from jax.experimental.pallas import tpu as pltpu

HIDDEN_SIZE = 32
INPUT_SIZE = 10
NUM_LAYERS = 2
OUTPUT_SIZE = 1


def _lstm_kernel(x_ref,     # (S*B, I)   time-major flattened input
                 wih0_ref,  # (I, 4H)    W_ih0^T
                 b0_ref,    # (1, 4H)    b_ih0 + b_hh0
                 whh0_ref,  # (H, 4H)    W_hh0^T
                 whh1_ref,  # (H, 4H)    W_hh1^T
                 wih1_ref,  # (H, 4H)    W_ih1^T
                 b1_ref,    # (1, 4H)    b_ih1 + b_hh1
                 wfc_ref,   # (1, H)     fc weight row
                 bfc_ref,   # (1, OUT)
                 out_ref):  # (B, OUT)
    SB = x_ref.shape[0]
    H4 = whh0_ref.shape[1]
    H = H4 // 4
    B = out_ref.shape[0]
    S = SB // B
    f32 = jnp.float32

    # ---- prologue: hoisted layer-0 input projection (off the serial path) ----
    gx = jnp.dot(x_ref[...], wih0_ref[...],
                 preferred_element_type=f32) + b0_ref[...]        # (S*B, 4H)

    whh0 = whh0_ref[...]
    whh1 = whh1_ref[...]
    wih1 = wih1_ref[...]

    # Hoisted bias broadcast (not re-emitted per unrolled step).
    b1b = jnp.broadcast_to(b1_ref[...], (B, H4))

    # Lane-mask prescale for the single-tanh gate activation:
    #   sigmoid(x) = 0.5*(1 + tanh(x/2))  -> scale i/f/o lanes by 0.5, g by 1.
    lane = lax.broadcasted_iota(jnp.int32, (B, H4), 1)
    is_g = (lane >= 2 * H) & (lane < 3 * H)
    gate_scale = jnp.where(is_g, f32(1.0), f32(0.5))               # (B, 4H)

    def cell(gates, c_prev):
        t = jnp.tanh(gates * gate_scale)       # one EUP push for all 4H lanes
        i = 0.5 * t[:, 0 * H:1 * H] + 0.5      # sigmoid via tanh identity
        f = 0.5 * t[:, 1 * H:2 * H] + 0.5
        g = t[:, 2 * H:3 * H]                  # pure tanh lanes
        o = 0.5 * t[:, 3 * H:4 * H] + 0.5
        c_new = f * c_prev + i * g
        h_new = o * jnp.tanh(c_new)
        return h_new, c_new

    z = jnp.zeros((B, H), f32)
    h0, c0, h1, c1 = z, z, z, z

    # S is small and static: a full static unroll keeps every gx slice static
    # and gives the scheduler full visibility of the dependency chain.
    # TODO(synk): for long sequences, move to a time-chunked grid with
    # pl.Buffered(2) gx slabs sized against the per-generation VMEM budget
    # (64 MiB physical / 32 MiB scoped on v7x vs 128 MiB on v5e/v6e).
    for t in range(S):
        # Layer-1 recurrent matmul at the TOP of the step: depends only on the
        # previous step's h1, so it overlaps layer 0's matmul + cell.
        g1_rec = jnp.dot(h1, whh1, preferred_element_type=f32)
        g0 = gx[t * B:(t + 1) * B, :] + jnp.dot(h0, whh0,
                                                preferred_element_type=f32)
        h0, c0 = cell(g0, c0)
        g1 = g1_rec + jnp.dot(h0, wih1, preferred_element_type=f32) + b1b
        h1, c1 = cell(g1, c1)

    # ---- fc(out[:, -1, :]); OUT=1 -> VPU multiply + lane reduce, no N=1 MXU push
    y = jnp.sum(h1 * wfc_ref[...], axis=-1, keepdims=True) + bfc_ref[...]
    out_ref[...] = y.astype(out_ref.dtype)


def init_params(key, input_size=INPUT_SIZE, hidden_size=HIDDEN_SIZE,
                output_size=OUTPUT_SIZE):
    """Deterministic init mimicking PyTorch's U(-1/sqrt(H), 1/sqrt(H))."""
    bound = 1.0 / jnp.sqrt(jnp.float32(hidden_size))
    keys = jax.random.split(key, 10)
    u = lambda k, shape: jax.random.uniform(
        k, shape, dtype=jnp.float32, minval=-bound, maxval=bound)
    return {
        # layer 0
        "w_ih_l0": u(keys[0], (4 * hidden_size, input_size)),
        "w_hh_l0": u(keys[1], (4 * hidden_size, hidden_size)),
        "b_ih_l0": u(keys[2], (4 * hidden_size,)),
        "b_hh_l0": u(keys[3], (4 * hidden_size,)),
        # layer 1
        "w_ih_l1": u(keys[4], (4 * hidden_size, hidden_size)),
        "w_hh_l1": u(keys[5], (4 * hidden_size, hidden_size)),
        "b_ih_l1": u(keys[6], (4 * hidden_size,)),
        "b_hh_l1": u(keys[7], (4 * hidden_size,)),
        # fc
        "w_fc": u(keys[8], (output_size, hidden_size)),
        "b_fc": u(keys[9], (output_size,)),
    }


@jax.jit
def lstm_model_forward(x, params):
    """x: (B, S, I) float32 -> (B, OUTPUT_SIZE) float32."""
    B, S, I = x.shape
    H = HIDDEN_SIZE
    OUT = OUTPUT_SIZE

    x = x.astype(jnp.float32)
    # Time-major flatten so each timestep is a contiguous (B, 4H) sublane
    # slice of the in-kernel gate projection.  (Tiny 640 B relayout; the input
    # projection itself happens inside the kernel.)
    x2d = jnp.transpose(x, (1, 0, 2)).reshape(S * B, I)

    wih0 = params["w_ih_l0"].T                                    # (I, 4H)
    b0 = (params["b_ih_l0"] + params["b_hh_l0"]).reshape(1, 4 * H)
    whh0 = params["w_hh_l0"].T                                    # (H, 4H)
    whh1 = params["w_hh_l1"].T                                    # (H, 4H)
    wih1 = params["w_ih_l1"].T                                    # (H, 4H)
    b1 = (params["b_ih_l1"] + params["b_hh_l1"]).reshape(1, 4 * H)
    wfc = params["w_fc"].reshape(1, H)                            # (1, H)
    bfc = params["b_fc"].reshape(1, OUT)

    vmem = pl.BlockSpec(memory_space=pltpu.MemorySpace.VMEM)
    # Single kernel invocation; every operand is a full VMEM-resident block,
    # loaded exactly once for the whole sequence.
    return pl.pallas_call(
        _lstm_kernel,
        out_shape=jax.ShapeDtypeStruct((B, OUT), jnp.float32),
        in_specs=[vmem] * 9,
        out_specs=vmem,
    )(x2d, wih0, b0, whh0, whh1, wih1, b1, wfc, bfc)


def _reference_forward(x, params):
    """Pure-JAX reference of the PyTorch module (for sanity check)."""
    B, S, I = x.shape
    H = HIDDEN_SIZE

    def cell(x_in, h, c, wih, whh, bih, bhh):
        g = x_in @ wih.T + bih + h @ whh.T + bhh
        i, f, gg, o = jnp.split(g, 4, axis=-1)
        c_new = jax.nn.sigmoid(f) * c + jax.nn.sigmoid(i) * jnp.tanh(gg)
        h_new = jax.nn.sigmoid(o) * jnp.tanh(c_new)
        return h_new, c_new

    h0 = c0 = h1 = c1 = jnp.zeros((B, H), jnp.float32)
    for t in range(S):
        h0, c0 = cell(x[:, t, :], h0, c0, params["w_ih_l0"],
                      params["w_hh_l0"], params["b_ih_l0"], params["b_hh_l0"])
        h1, c1 = cell(h0, h1, c1, params["w_ih_l1"],
                      params["w_hh_l1"], params["b_ih_l1"], params["b_hh_l1"])
    return h1 @ params["w_fc"].T + params["b_fc"]


if __name__ == "__main__":
    key = jax.random.PRNGKey(0)
    k_param, k_x = jax.random.split(key)

    batch, seq = 2, 8
    params = init_params(k_param)
    x = jax.random.normal(k_x, (batch, seq, INPUT_SIZE), dtype=jnp.float32)

    out = lstm_model_forward(x, params)
    out = jax.block_until_ready(out)

    ref = _reference_forward(x, params)
    assert out.shape == (batch, OUTPUT_SIZE)
    # Slightly relaxed vs 1e-5 to absorb the tanh-based sigmoid identity.
    assert jnp.allclose(out, ref, atol=1e-4, rtol=1e-4), (out, ref)

    print("KERNEL_OK")
</pallas_src>

<mosaic_0001>
module attributes {stable_mosaic.version = 11 : i64} {
  func.func @_lstm_kernel(%arg0: memref<16x10xf32, #tpu.memory_space<vmem>>, %arg1: memref<10x128xf32, #tpu.memory_space<vmem>>, %arg2: memref<1x128xf32, #tpu.memory_space<vmem>>, %arg3: memref<32x128xf32, #tpu.memory_space<vmem>>, %arg4: memref<32x128xf32, #tpu.memory_space<vmem>>, %arg5: memref<32x128xf32, #tpu.memory_space<vmem>>, %arg6: memref<1x128xf32, #tpu.memory_space<vmem>>, %arg7: memref<1x32xf32, #tpu.memory_space<vmem>>, %arg8: memref<1x1xf32, #tpu.memory_space<vmem>>, %arg9: memref<2x1xf32, #tpu.memory_space<vmem>>) attributes {dimension_semantics = [], scalar_prefetch = 0 : i64, scratch_operands = 0 : i64, tpu.core_type = #tpu.core_type<tc>} {
    %c0 = arith.constant 0 : index
    %c0_0 = arith.constant 0 : index
    %0 = vector.load %arg0[%c0, %c0_0] : memref<16x10xf32, #tpu.memory_space<vmem>>, vector<16x10xf32>
    %c0_1 = arith.constant 0 : index
    %c0_2 = arith.constant 0 : index
    %1 = vector.load %arg1[%c0_1, %c0_2] : memref<10x128xf32, #tpu.memory_space<vmem>>, vector<10x128xf32>
    %cst = arith.constant dense<0.000000e+00> : vector<16x128xf32>
    %2 = tpu.matmul %0, %1, %cst {dimension_numbers = #tpu.dot_dimension_numbers<[1], [0], [0], [1], [0, 0, 1, 1], [], []>} : vector<16x10xf32>, vector<10x128xf32>, vector<16x128xf32> -> vector<16x128xf32>
    %c0_3 = arith.constant 0 : index
    %c0_4 = arith.constant 0 : index
    %3 = vector.load %arg2[%c0_3, %c0_4] : memref<1x128xf32, #tpu.memory_space<vmem>>, vector<1x128xf32>
    %4 = vector.broadcast %3 : vector<1x128xf32> to vector<16x128xf32>
    %5 = arith.addf %2, %4 : vector<16x128xf32>
    %c0_5 = arith.constant 0 : index
    %c0_6 = arith.constant 0 : index
    %6 = vector.load %arg3[%c0_5, %c0_6] : memref<32x128xf32, #tpu.memory_space<vmem>>, vector<32x128xf32>
    %c0_7 = arith.constant 0 : index
    %c0_8 = arith.constant 0 : index
    %7 = vector.load %arg4[%c0_7, %c0_8] : memref<32x128xf32, #tpu.memory_space<vmem>>, vector<32x128xf32>
    %c0_9 = arith.constant 0 : index
    %c0_10 = arith.constant 0 : index
    %8 = vector.load %arg5[%c0_9, %c0_10] : memref<32x128xf32, #tpu.memory_space<vmem>>, vector<32x128xf32>
    %c0_11 = arith.constant 0 : index
    %c0_12 = arith.constant 0 : index
    %9 = vector.load %arg6[%c0_11, %c0_12] : memref<1x128xf32, #tpu.memory_space<vmem>>, vector<1x128xf32>
    %10 = vector.shape_cast %9 : vector<1x128xf32> to vector<1x128xf32>
    %11 = vector.broadcast %10 : vector<1x128xf32> to vector<2x128xf32>
    %12 = tpu.iota {dimensions = array<i32: 1>} : vector<2x128xi32>
    %c64_i32 = arith.constant 64 : i32
    %13 = vector.broadcast %c64_i32 : i32 to vector<2x128xi32>
    %14 = arith.cmpi sge, %12, %13 : vector<2x128xi32>
    %c96_i32 = arith.constant 96 : i32
    %15 = vector.broadcast %c96_i32 : i32 to vector<2x128xi32>
    %16 = arith.cmpi slt, %12, %15 : vector<2x128xi32>
    %17 = arith.andi %14, %16 : vector<2x128xi1>
    %cst_13 = arith.constant 1.000000e+00 : f32
    %cst_14 = arith.constant 5.000000e-01 : f32
    %18 = vector.broadcast %cst_13 : f32 to vector<2x128xf32>
    %19 = vector.broadcast %cst_14 : f32 to vector<2x128xf32>
    %20 = arith.select %17, %18, %19 : vector<2x128xi1>, vector<2x128xf32>
    %cst_15 = arith.constant 0.000000e+00 : f32
    %21 = vector.broadcast %cst_15 : f32 to vector<2x32xf32>
    %cst_16 = arith.constant dense<0.000000e+00> : vector<2x128xf32>
    %22 = tpu.matmul %21, %7, %cst_16 {dimension_numbers = #tpu.dot_dimension_numbers<[1], [0], [0], [1], [0, 0, 1, 1], [], []>} : vector<2x32xf32>, vector<32x128xf32>, vector<2x128xf32> -> vector<2x128xf32>
    %23 = vector.extract_strided_slice %5 {offsets = [0, 0], sizes = [2, 128], strides = [1, 1]} : vector<16x128xf32> to vector<2x128xf32>
    %cst_17 = arith.constant dense<0.000000e+00> : vector<2x128xf32>
    %24 = tpu.matmul %21, %6, %cst_17 {dimension_numbers = #tpu.dot_dimension_numbers<[1], [0], [0], [1], [0, 0, 1, 1], [], []>} : vector<2x32xf32>, vector<32x128xf32>, vector<2x128xf32> -> vector<2x128xf32>
    %25 = arith.addf %23, %24 : vector<2x128xf32>
    %26 = arith.mulf %25, %20 : vector<2x128xf32>
    %27 = math.tanh %26 : vector<2x128xf32>
    %28 = vector.extract_strided_slice %27 {offsets = [0, 0], sizes = [2, 32], strides = [1, 1]} : vector<2x128xf32> to vector<2x32xf32>
    %cst_18 = arith.constant 5.000000e-01 : f32
    %29 = vector.broadcast %cst_18 : f32 to vector<2x32xf32>
    %30 = arith.mulf %29, %28 : vector<2x32xf32>
    %cst_19 = arith.constant 5.000000e-01 : f32
    %31 = vector.broadcast %cst_19 : f32 to vector<2x32xf32>
    %32 = arith.addf %30, %31 : vector<2x32xf32>
    %33 = vector.extract_strided_slice %27 {offsets = [0, 32], sizes = [2, 32], strides = [1, 1]} : vector<2x128xf32> to vector<2x32xf32>
    %cst_20 = arith.constant 5.000000e-01 : f32
    %34 = vector.broadcast %cst_20 : f32 to vector<2x32xf32>
    %35 = arith.mulf %34, %33 : vector<2x32xf32>
    %cst_21 = arith.constant 5.000000e-01 : f32
    %36 = vector.broadcast %cst_21 : f32 to vector<2x32xf32>
    %37 = arith.addf %35, %36 : vector<2x32xf32>
    %38 = vector.extract_strided_slice %27 {offsets = [0, 64], sizes = [2, 32], strides = [1, 1]} : vector<2x128xf32> to vector<2x32xf32>
    %39 = vector.extract_strided_slice %27 {offsets = [0, 96], sizes = [2, 32], strides = [1, 1]} : vector<2x128xf32> to vector<2x32xf32>
    %cst_22 = arith.constant 5.000000e-01 : f32
    %40 = vector.broadcast %cst_22 : f32 to vector<2x32xf32>
    %41 = arith.mulf %40, %39 : vector<2x32xf32>
    %cst_23 = arith.constant 5.000000e-01 : f32
    %42 = vector.broadcast %cst_23 : f32 to vector<2x32xf32>
    %43 = arith.addf %41, %42 : vector<2x32xf32>
    %44 = arith.mulf %37, %21 : vector<2x32xf32>
    %45 = arith.mulf %32, %38 : vector<2x32xf32>
    %46 = arith.addf %44, %45 : vector<2x32xf32>
    %47 = math.tanh %46 : vector<2x32xf32>
    %48 = arith.mulf %43, %47 : vector<2x32xf32>
    %cst_24 = arith.constant dense<0.000000e+00> : vector<2x128xf32>
    %49 = tpu.matmul %48, %8, %cst_24 {dimension_numbers = #tpu.dot_dimension_numbers<[1], [0], [0], [1], [0, 0, 1, 1], [], []>} : vector<2x32xf32>, vector<32x128xf32>, vector<2x128xf32> -> vector<2x128xf32>
    %50 = arith.addf %22, %49 : vector<2x128xf32>
    %51 = arith.addf %50, %11 : vector<2x128xf32>
    %52 = arith.mulf %51, %20 : vector<2x128xf32>
    %53 = math.tanh %52 : vector<2x128xf32>
    %54 = vector.extract_strided_slice %53 {offsets = [0, 0], sizes = [2, 32], strides = [1, 1]} : vector<2x128xf32> to vector<2x32xf32>
    %cst_25 = arith.constant 5.000000e-01 : f32
    %55 = vector.broadcast %cst_25 : f32 to vector<2x32xf32>
    %56 = arith.mulf %55, %54 : vector<2x32xf32>
    %cst_26 = arith.constant 5.000000e-01 : f32
    %57 = vector.broadcast %cst_26 : f32 to vector<2x32xf32>
    %58 = arith.addf %56, %57 : vector<2x32xf32>
    %59 = vector.extract_strided_slice %53 {offsets = [0, 32], sizes = [2, 32], strides = [1, 1]} : vector<2x128xf32> to vector<2x32xf32>
    %cst_27 = arith.constant 5.000000e-01 : f32
    %60 = vector.broadcast %cst_27 : f32 to vector<2x32xf32>
    %61 = arith.mulf %60, %59 : vector<2x32xf32>
    %cst_28 = arith.constant 5.000000e-01 : f32
    %62 = vector.broadcast %cst_28 : f32 to vector<2x32xf32>
    %63 = arith.addf %61, %62 : vector<2x32xf32>
    %64 = vector.extract_strided_slice %53 {offsets = [0, 64], sizes = [2, 32], strides = [1, 1]} : vector<2x128xf32> to vector<2x32xf32>
    %65 = vector.extract_strided_slice %53 {offsets = [0, 96], sizes = [2, 32], strides = [1, 1]} : vector<2x128xf32> to vector<2x32xf32>
    %cst_29 = arith.constant 5.000000e-01 : f32
    %66 = vector.broadcast %cst_29 : f32 to vector<2x32xf32>
    %67 = arith.mulf %66, %65 : vector<2x32xf32>
    %cst_30 = arith.constant 5.000000e-01 : f32
    %68 = vector.broadcast %cst_30 : f32 to vector<2x32xf32>
    %69 = arith.addf %67, %68 : vector<2x32xf32>
    %70 = arith.mulf %63, %21 : vector<2x32xf32>
    %71 = arith.mulf %58, %64 : vector<2x32xf32>
    %72 = arith.addf %70, %71 : vector<2x32xf32>
    %73 = math.tanh %72 : vector<2x32xf32>
    %74 = arith.mulf %69, %73 : vector<2x32xf32>
    %cst_31 = arith.constant dense<0.000000e+00> : vector<2x128xf32>
    %75 = tpu.matmul %74, %7, %cst_31 {dimension_numbers = #tpu.dot_dimension_numbers<[1], [0], [0], [1], [0, 0, 1, 1], [], []>} : vector<2x32xf32>, vector<32x128xf32>, vector<2x128xf32> -> vector<2x128xf32>
    %76 = vector.extract_strided_slice %5 {offsets = [2, 0], sizes = [2, 128], strides = [1, 1]} : vector<16x128xf32> to vector<2x128xf32>
    %cst_32 = arith.constant dense<0.000000e+00> : vector<2x128xf32>
    %77 = tpu.matmul %48, %6, %cst_32 {dimension_numbers = #tpu.dot_dimension_numbers<[1], [0], [0], [1], [0, 0, 1, 1], [], []>} : vector<2x32xf32>, vector<32x128xf32>, vector<2x128xf32> -> vector<2x128xf32>
    %78 = arith.addf %76, %77 : vector<2x128xf32>
    %79 = arith.mulf %78, %20 : vector<2x128xf32>
    %80 = math.tanh %79 : vector<2x128xf32>
    %81 = vector.extract_strided_slice %80 {offsets = [0, 0], sizes = [2, 32], strides = [1, 1]} : vector<2x128xf32> to vector<2x32xf32>
    %cst_33 = arith.constant 5.000000e-01 : f32
    %82 = vector.broadcast %cst_33 : f32 to vector<2x32xf32>
    %83 = arith.mulf %82, %81 : vector<2x32xf32>
    %cst_34 = arith.constant 5.000000e-01 : f32
    %84 = vector.broadcast %cst_34 : f32 to vector<2x32xf32>
    %85 = arith.addf %83, %84 : vector<2x32xf32>
    %86 = vector.extract_strided_slice %80 {offsets = [0, 32], sizes = [2, 32], strides = [1, 1]} : vector<2x128xf32> to vector<2x32xf32>
    %cst_35 = arith.constant 5.000000e-01 : f32
    %87 = vector.broadcast %cst_35 : f32 to vector<2x32xf32>
    %88 = arith.mulf %87, %86 : vector<2x32xf32>
    %cst_36 = arith.constant 5.000000e-01 : f32
    %89 = vector.broadcast %cst_36 : f32 to vector<2x32xf32>
    %90 = arith.addf %88, %89 : vector<2x32xf32>
    %91 = vector.extract_strided_slice %80 {offsets = [0, 64], sizes = [2, 32], strides = [1, 1]} : vector<2x128xf32> to vector<2x32xf32>
    %92 = vector.extract_strided_slice %80 {offsets = [0, 96], sizes = [2, 32], strides = [1, 1]} : vector<2x128xf32> to vector<2x32xf32>
    %cst_37 = arith.constant 5.000000e-01 : f32
    %93 = vector.broadcast %cst_37 : f32 to vector<2x32xf32>
    %94 = arith.mulf %93, %92 : vector<2x32xf32>
    %cst_38 = arith.constant 5.000000e-01 : f32
    %95 = vector.broadcast %cst_38 : f32 to vector<2x32xf32>
    %96 = arith.addf %94, %95 : vector<2x32xf32>
    %97 = arith.mulf %90, %46 : vector<2x32xf32>
    %98 = arith.mulf %85, %91 : vector<2x32xf32>
    %99 = arith.addf %97, %98 : vector<2x32xf32>
    %100 = math.tanh %99 : vector<2x32xf32>
    %101 = arith.mulf %96, %100 : vector<2x32xf32>
    %cst_39 = arith.constant dense<0.000000e+00> : vector<2x128xf32>
    %102 = tpu.matmul %101, %8, %cst_39 {dimension_numbers = #tpu.dot_dimension_numbers<[1], [0], [0], [1], [0, 0, 1, 1], [], []>} : vector<2x32xf32>, vector<32x128xf32>, vector<2x128xf32> -> vector<2x128xf32>
    %103 = arith.addf %75, %102 : vector<2x128xf32>
    %104 = arith.addf %103, %11 : vector<2x128xf32>
    %105 = arith.mulf %104, %20 : vector<2x128xf32>
    %106 = math.tanh %105 : vector<2x128xf32>
    %107 = vector.extract_strided_slice %106 {offsets = [0, 0], sizes = [2, 32], strides = [1, 1]} : vector<2x128xf32> to vector<2x32xf32>
    %cst_40 = arith.constant 5.000000e-01 : f32
    %108 = vector.broadcast %cst_40 : f32 to vector<2x32xf32>
    %109 = arith.mulf %108, %107 : vector<2x32xf32>
    %cst_41 = arith.constant 5.000000e-01 : f32
    %110 = vector.broadcast %cst_41 : f32 to vector<2x32xf32>
    %111 = arith.addf %109, %110 : vector<2x32xf32>
    %112 = vector.extract_strided_slice %106 {offsets = [0, 32], sizes = [2, 32], strides = [1, 1]} : vector<2x128xf32> to vector<2x32xf32>
    %cst_42 = arith.constant 5.000000e-01 : f32
    %113 = vector.broadcast %cst_42 : f32 to vector<2x32xf32>
    %114 = arith.mulf %113, %112 : vector<2x32xf32>
    %cst_43 = arith.constant 5.000000e-01 : f32
    %115 = vector.broadcast %cst_43 : f32 to vector<2x32xf32>
    %116 = arith.addf %114, %115 : vector<2x32xf32>
    %117 = vector.extract_strided_slice %106 {offsets = [0, 64], sizes = [2, 32], strides = [1, 1]} : vector<2x128xf32> to vector<2x32xf32>
    %118 = vector.extract_strided_slice %106 {offsets = [0, 96], sizes = [2, 32], strides = [1, 1]} : vector<2x128xf32> to vector<2x32xf32>
    %cst_44 = arith.constant 5.000000e-01 : f32
    %119 = vector.broadcast %cst_44 : f32 to vector<2x32xf32>
    %120 = arith.mulf %119, %118 : vector<2x32xf32>
    %cst_45 = arith.constant 5.000000e-01 : f32
    %121 = vector.broadcast %cst_45 : f32 to vector<2x32xf32>
    %122 = arith.addf %120, %121 : vector<2x32xf32>
    %123 = arith.mulf %116, %72 : vector<2x32xf32>
    %124 = arith.mulf %111, %117 : vector<2x32xf32>
    %125 = arith.addf %123, %124 : vector<2x32xf32>
    %126 = math.tanh %125 : vector<2x32xf32>
    %127 = arith.mulf %122, %126 : vector<2x32xf32>
    %cst_46 = arith.constant dense<0.000000e+00> : vector<2x128xf32>
    %128 = tpu.matmul %127, %7, %cst_46 {dimension_numbers = #tpu.dot_dimension_numbers<[1], [0], [0], [1], [0, 0, 1, 1], [], []>} : vector<2x32xf32>, vector<32x128xf32>, vector<2x128xf32> -> vector<2x128xf32>
    %129 = vector.extract_strided_slice %5 {offsets = [4, 0], sizes = [2, 128], strides = [1, 1]} : vector<16x128xf32> to vector<2x128xf32>
    %cst_47 = arith.constant dense<0.000000e+00> : vector<2x128xf32>
    %130 = tpu.matmul %101, %6, %cst_47 {dimension_numbers = #tpu.dot_dimension_numbers<[1], [0], [0], [1], [0, 0, 1, 1], [], []>} : vector<2x32xf32>, vector<32x128xf32>, vector<2x128xf32> -> vector<2x128xf32>
    %131 = arith.addf %129, %130 : vector<2x128xf32>
    %132 = arith.mulf %131, %20 : vector<2x128xf32>
    %133 = math.tanh %132 : vector<2x128xf32>
    %134 = vector.extract_strided_slice %133 {offsets = [0, 0], sizes = [2, 32], strides = [1, 1]} : vector<2x128xf32> to vector<2x32xf32>
    %cst_48 = arith.constant 5.000000e-01 : f32
    %135 = vector.broadcast %cst_48 : f32 to vector<2x32xf32>
    %136 = arith.mulf %135, %134 : vector<2x32xf32>
    %cst_49 = arith.constant 5.000000e-01 : f32
    %137 = vector.broadcast %cst_49 : f32 to vector<2x32xf32>
    %138 = arith.addf %136, %137 : vector<2x32xf32>
    %139 = vector.extract_strided_slice %133 {offsets = [0, 32], sizes = [2, 32], strides = [1, 1]} : vector<2x128xf32> to vector<2x32xf32>
    %cst_50 = arith.constant 5.000000e-01 : f32
    %140 = vector.broadcast %cst_50 : f32 to vector<2x32xf32>
    %141 = arith.mulf %140, %139 : vector<2x32xf32>
    %cst_51 = arith.constant 5.000000e-01 : f32
    %142 = vector.broadcast %cst_51 : f32 to vector<2x32xf32>
    %143 = arith.addf %141, %142 : vector<2x32xf32>
    %144 = vector.extract_strided_slice %133 {offsets = [0, 64], sizes = [2, 32], strides = [1, 1]} : vector<2x128xf32> to vector<2x32xf32>
    %145 = vector.extract_strided_slice %133 {offsets = [0, 96], sizes = [2, 32], strides = [1, 1]} : vector<2x128xf32> to vector<2x32xf32>
    %cst_52 = arith.constant 5.000000e-01 : f32
    %146 = vector.broadcast %cst_52 : f32 to vector<2x32xf32>
    %147 = arith.mulf %146, %145 : vector<2x32xf32>
    %cst_53 = arith.constant 5.000000e-01 : f32
    %148 = vector.broadcast %cst_53 : f32 to vector<2x32xf32>
    %149 = arith.addf %147, %148 : vector<2x32xf32>
    %150 = arith.mulf %143, %99 : vector<2x32xf32>
    %151 = arith.mulf %138, %144 : vector<2x32xf32>
    %152 = arith.addf %150, %151 : vector<2x32xf32>
    %153 = math.tanh %152 : vector<2x32xf32>
    %154 = arith.mulf %149, %153 : vector<2x32xf32>
    %cst_54 = arith.constant dense<0.000000e+00> : vector<2x128xf32>
    %155 = tpu.matmul %154, %8, %cst_54 {dimension_numbers = #tpu.dot_dimension_numbers<[1], [0], [0], [1], [0, 0, 1, 1], [], []>} : vector<2x32xf32>, vector<32x128xf32>, vector<2x128xf32> -> vector<2x128xf32>
    %156 = arith.addf %128, %155 : vector<2x128xf32>
    %157 = arith.addf %156, %11 : vector<2x128xf32>
    %158 = arith.mulf %157, %20 : vector<2x128xf32>
    %159 = math.tanh %158 : vector<2x128xf32>
    %160 = vector.extract_strided_slice %159 {offsets = [0, 0], sizes = [2, 32], strides = [1, 1]} : vector<2x128xf32> to vector<2x32xf32>
    %cst_55 = arith.constant 5.000000e-01 : f32
    %161 = vector.broadcast %cst_55 : f32 to vector<2x32xf32>
    %162 = arith.mulf %161, %160 : vector<2x32xf32>
    %cst_56 = arith.constant 5.000000e-01 : f32
    %163 = vector.broadcast %cst_56 : f32 to vector<2x32xf32>
    %164 = arith.addf %162, %163 : vector<2x32xf32>
    %165 = vector.extract_strided_slice %159 {offsets = [0, 32], sizes = [2, 32], strides = [1, 1]} : vector<2x128xf32> to vector<2x32xf32>
    %cst_57 = arith.constant 5.000000e-01 : f32
    %166 = vector.broadcast %cst_57 : f32 to vector<2x32xf32>
    %167 = arith.mulf %166, %165 : vector<2x32xf32>
    %cst_58 = arith.constant 5.000000e-01 : f32
    %168 = vector.broadcast %cst_58 : f32 to vector<2x32xf32>
    %169 = arith.addf %167, %168 : vector<2x32xf32>
    %170 = vector.extract_strided_slice %159 {offsets = [0, 64], sizes = [2, 32], strides = [1, 1]} : vector<2x128xf32> to vector<2x32xf32>
    %171 = vector.extract_strided_slice %159 {offsets = [0, 96], sizes = [2, 32], strides = [1, 1]} : vector<2x128xf32> to vector<2x32xf32>
    %cst_59 = arith.constant 5.000000e-01 : f32
    %172 = vector.broadcast %cst_59 : f32 to vector<2x32xf32>
    %173 = arith.mulf %172, %171 : vector<2x32xf32>
    %cst_60 = arith.constant 5.000000e-01 : f32
    %174 = vector.broadcast %cst_60 : f32 to vector<2x32xf32>
    %175 = arith.addf %173, %174 : vector<2x32xf32>
    %176 = arith.mulf %169, %125 : vector<2x32xf32>
    %177 = arith.mulf %164, %170 : vector<2x32xf32>
    %178 = arith.addf %176, %177 : vector<2x32xf32>
    %179 = math.tanh %178 : vector<2x32xf32>
    %180 = arith.mulf %175, %179 : vector<2x32xf32>
    %cst_61 = arith.constant dense<0.000000e+00> : vector<2x128xf32>
    %181 = tpu.matmul %180, %7, %cst_61 {dimension_numbers = #tpu.dot_dimension_numbers<[1], [0], [0], [1], [0, 0, 1, 1], [], []>} : vector<2x32xf32>, vector<32x128xf32>, vector<2x128xf32> -> vector<2x128xf32>
    %182 = vector.extract_strided_slice %5 {offsets = [6, 0], sizes = [2, 128], strides = [1, 1]} : vector<16x128xf32> to vector<2x128xf32>
    %cst_62 = arith.constant dense<0.000000e+00> : vector<2x128xf32>
    %183 = tpu.matmul %154, %6, %cst_62 {dimension_numbers = #tpu.dot_dimension_numbers<[1], [0], [0], [1], [0, 0, 1, 1], [], []>} : vector<2x32xf32>, vector<32x128xf32>, vector<2x128xf32> -> vector<2x128xf32>
    %184 = arith.addf %182, %183 : vector<2x128xf32>
    %185 = arith.mulf %184, %20 : vector<2x128xf32>
    %186 = math.tanh %185 : vector<2x128xf32>
    %187 = vector.extract_strided_slice %186 {offsets = [0, 0], sizes = [2, 32], strides = [1, 1]} : vector<2x128xf32> to vector<2x32xf32>
    %cst_63 = arith.constant 5.000000e-01 : f32
    %188 = vector.broadcast %cst_63 : f32 to vector<2x32xf32>
    %189 = arith.mulf %188, %187 : vector<2x32xf32>
    %cst_64 = arith.constant 5.000000e-01 : f32
    %190 = vector.broadcast %cst_64 : f32 to vector<2x32xf32>
    %191 = arith.addf %189, %190 : vector<2x32xf32>
    %192 = vector.extract_strided_slice %186 {offsets = [0, 32], sizes = [2, 32], strides = [1, 1]} : vector<2x128xf32> to vector<2x32xf32>
    %cst_65 = arith.constant 5.000000e-01 : f32
    %193 = vector.broadcast %cst_65 : f32 to vector<2x32xf32>
    %194 = arith.mulf %193, %192 : vector<2x32xf32>
    %cst_66 = arith.constant 5.000000e-01 : f32
    %195 = vector.broadcast %cst_66 : f32 to vector<2x32xf32>
    %196 = arith.addf %194, %195 : vector<2x32xf32>
    %197 = vector.extract_strided_slice %186 {offsets = [0, 64], sizes = [2, 32], strides = [1, 1]} : vector<2x128xf32> to vector<2x32xf32>
    %198 = vector.extract_strided_slice %186 {offsets = [0, 96], sizes = [2, 32], strides = [1, 1]} : vector<2x128xf32> to vector<2x32xf32>
    %cst_67 = arith.constant 5.000000e-01 : f32
    %199 = vector.broadcast %cst_67 : f32 to vector<2x32xf32>
    %200 = arith.mulf %199, %198 : vector<2x32xf32>
    %cst_68 = arith.constant 5.000000e-01 : f32
    %201 = vector.broadcast %cst_68 : f32 to vector<2x32xf32>
    %202 = arith.addf %200, %201 : vector<2x32xf32>
    %203 = arith.mulf %196, %152 : vector<2x32xf32>
    %204 = arith.mulf %191, %197 : vector<2x32xf32>
    %205 = arith.addf %203, %204 : vector<2x32xf32>
    %206 = math.tanh %205 : vector<2x32xf32>
    %207 = arith.mulf %202, %206 : vector<2x32xf32>
    %cst_69 = arith.constant dense<0.000000e+00> : vector<2x128xf32>
    %208 = tpu.matmul %207, %8, %cst_69 {dimension_numbers = #tpu.dot_dimension_numbers<[1], [0], [0], [1], [0, 0, 1, 1], [], []>} : vector<2x32xf32>, vector<32x128xf32>, vector<2x128xf32> -> vector<2x128xf32>
    %209 = arith.addf %181, %208 : vector<2x128xf32>
    %210 = arith.addf %209, %11 : vector<2x128xf32>
    %211 = arith.mulf %210, %20 : vector<2x128xf32>
    %212 = math.tanh %211 : vector<2x128xf32>
    %213 = vector.extract_strided_slice %212 {offsets = [0, 0], sizes = [2, 32], strides = [1, 1]} : vector<2x128xf32> to vector<2x32xf32>
    %cst_70 = arith.constant 5.000000e-01 : f32
    %214 = vector.broadcast %cst_70 : f32 to vector<2x32xf32>
    %215 = arith.mulf %214, %213 : vector<2x32xf32>
    %cst_71 = arith.constant 5.000000e-01 : f32
    %216 = vector.broadcast %cst_71 : f32 to vector<2x32xf32>
    %217 = arith.addf %215, %216 : vector<2x32xf32>
    %218 = vector.extract_strided_slice %212 {offsets = [0, 32], sizes = [2, 32], strides = [1, 1]} : vector<2x128xf32> to vector<2x32xf32>
    %cst_72 = arith.constant 5.000000e-01 : f32
    %219 = vector.broadcast %cst_72 : f32 to vector<2x32xf32>
    %220 = arith.mulf %219, %218 : vector<2x32xf32>
    %cst_73 = arith.constant 5.000000e-01 : f32
    %221 = vector.broadcast %cst_73 : f32 to vector<2x32xf32>
    %222 = arith.addf %220, %221 : vector<2x32xf32>
    %223 = vector.extract_strided_slice %212 {offsets = [0, 64], sizes = [2, 32], strides = [1, 1]} : vector<2x128xf32> to vector<2x32xf32>
    %224 = vector.extract_strided_slice %212 {offsets = [0, 96], sizes = [2, 32], strides = [1, 1]} : vector<2x128xf32> to vector<2x32xf32>
    %cst_74 = arith.constant 5.000000e-01 : f32
    %225 = vector.broadcast %cst_74 : f32 to vector<2x32xf32>
    %226 = arith.mulf %225, %224 : vector<2x32xf32>
    %cst_75 = arith.constant 5.000000e-01 : f32
    %227 = vector.broadcast %cst_75 : f32 to vector<2x32xf32>
    %228 = arith.addf %226, %227 : vector<2x32xf32>
    %229 = arith.mulf %222, %178 : vector<2x32xf32>
    %230 = arith.mulf %217, %223 : vector<2x32xf32>
    %231 = arith.addf %229, %230 : vector<2x32xf32>
    %232 = math.tanh %231 : vector<2x32xf32>
    %233 = arith.mulf %228, %232 : vector<2x32xf32>
    %cst_76 = arith.constant dense<0.000000e+00> : vector<2x128xf32>
    %234 = tpu.matmul %233, %7, %cst_76 {dimension_numbers = #tpu.dot_dimension_numbers<[1], [0], [0], [1], [0, 0, 1, 1], [], []>} : vector<2x32xf32>, vector<32x128xf32>, vector<2x128xf32> -> vector<2x128xf32>
    %235 = vector.extract_strided_slice %5 {offsets = [8, 0], sizes = [2, 128], strides = [1, 1]} : vector<16x128xf32> to vector<2x128xf32>
    %cst_77 = arith.constant dense<0.000000e+00> : vector<2x128xf32>
    %236 = tpu.matmul %207, %6, %cst_77 {dimension_numbers = #tpu.dot_dimension_numbers<[1], [0], [0], [1], [0, 0, 1, 1], [], []>} : vector<2x32xf32>, vector<32x128xf32>, vector<2x128xf32> -> vector<2x128xf32>
    %237 = arith.addf %235, %236 : vector<2x128xf32>
    %238 = arith.mulf %237, %20 : vector<2x128xf32>
    %239 = math.tanh %238 : vector<2x128xf32>
    %240 = vector.extract_strided_slice %239 {offsets = [0, 0], sizes = [2, 32], strides = [1, 1]} : vector<2x128xf32> to vector<2x32xf32>
    %cst_78 = arith.constant 5.000000e-01 : f32
    %241 = vector.broadcast %cst_78 : f32 to vector<2x32xf32>
    %242 = arith.mulf %241, %240 : vector<2x32xf32>
    %cst_79 = arith.constant 5.000000e-01 : f32
    %243 = vector.broadcast %cst_79 : f32 to vector<2x32xf32>
    %244 = arith.addf %242, %243 : vector<2x32xf32>
    %245 = vector.extract_strided_slice %239 {offsets = [0, 32], sizes = [2, 32], strides = [1, 1]} : vector<2x128xf32> to vector<2x32xf32>
    %cst_80 = arith.constant 5.000000e-01 : f32
    %246 = vector.broadcast %cst_80 : f32 to vector<2x32xf32>
    %247 = arith.mulf %246, %245 : vector<2x32xf32>
    %cst_81 = arith.constant 5.000000e-01 : f32
    %248 = vector.broadcast %cst_81 : f32 to vector<2x32xf32>
    %249 = arith.addf %247, %248 : vector<2x32xf32>
    %250 = vector.extract_strided_slice %239 {offsets = [0, 64], sizes = [2, 32], strides = [1, 1]} : vector<2x128xf32> to vector<2x32xf32>
    %251 = vector.extract_strided_slice %239 {offsets = [0, 96], sizes = [2, 32], strides = [1, 1]} : vector<2x128xf32> to vector<2x32xf32>
    %cst_82 = arith.constant 5.000000e-01 : f32
    %252 = vector.broadcast %cst_82 : f32 to vector<2x32xf32>
    %253 = arith.mulf %252, %251 : vector<2x32xf32>
    %cst_83 = arith.constant 5.000000e-01 : f32
    %254 = vector.broadcast %cst_83 : f32 to vector<2x32xf32>
    %255 = arith.addf %253, %254 : vector<2x32xf32>
    %256 = arith.mulf %249, %205 : vector<2x32xf32>
    %257 = arith.mulf %244, %250 : vector<2x32xf32>
    %258 = arith.addf %256, %257 : vector<2x32xf32>
    %259 = math.tanh %258 : vector<2x32xf32>
    %260 = arith.mulf %255, %259 : vector<2x32xf32>
    %cst_84 = arith.constant dense<0.000000e+00> : vector<2x128xf32>
    %261 = tpu.matmul %260, %8, %cst_84 {dimension_numbers = #tpu.dot_dimension_numbers<[1], [0], [0], [1], [0, 0, 1, 1], [], []>} : vector<2x32xf32>, vector<32x128xf32>, vector<2x128xf32> -> vector<2x128xf32>
    %262 = arith.addf %234, %261 : vector<2x128xf32>
    %263 = arith.addf %262, %11 : vector<2x128xf32>
    %264 = arith.mulf %263, %20 : vector<2x128xf32>
    %265 = math.tanh %264 : vector<2x128xf32>
    %266 = vector.extract_strided_slice %265 {offsets = [0, 0], sizes = [2, 32], strides = [1, 1]} : vector<2x128xf32> to vector<2x32xf32>
    %cst_85 = arith.constant 5.000000e-01 : f32
    %267 = vector.broadcast %cst_85 : f32 to vector<2x32xf32>
    %268 = arith.mulf %267, %266 : vector<2x32xf32>
    %cst_86 = arith.constant 5.000000e-01 : f32
    %269 = vector.broadcast %cst_86 : f32 to vector<2x32xf32>
    %270 = arith.addf %268, %269 : vector<2x32xf32>
    %271 = vector.extract_strided_slice %265 {offsets = [0, 32], sizes = [2, 32], strides = [1, 1]} : vector<2x128xf32> to vector<2x32xf32>
    %cst_87 = arith.constant 5.000000e-01 : f32
    %272 = vector.broadcast %cst_87 : f32 to vector<2x32xf32>
    %273 = arith.mulf %272, %271 : vector<2x32xf32>
    %cst_88 = arith.constant 5.000000e-01 : f32
    %274 = vector.broadcast %cst_88 : f32 to vector<2x32xf32>
    %275 = arith.addf %273, %274 : vector<2x32xf32>
    %276 = vector.extract_strided_slice %265 {offsets = [0, 64], sizes = [2, 32], strides = [1, 1]} : vector<2x128xf32> to vector<2x32xf32>
    %277 = vector.extract_strided_slice %265 {offsets = [0, 96], sizes = [2, 32], strides = [1, 1]} : vector<2x128xf32> to vector<2x32xf32>
    %cst_89 = arith.constant 5.000000e-01 : f32
    %278 = vector.broadcast %cst_89 : f32 to vector<2x32xf32>
    %279 = arith.mulf %278, %277 : vector<2x32xf32>
    %cst_90 = arith.constant 5.000000e-01 : f32
    %280 = vector.broadcast %cst_90 : f32 to vector<2x32xf32>
    %281 = arith.addf %279, %280 : vector<2x32xf32>
    %282 = arith.mulf %275, %231 : vector<2x32xf32>
    %283 = arith.mulf %270, %276 : vector<2x32xf32>
    %284 = arith.addf %282, %283 : vector<2x32xf32>
    %285 = math.tanh %284 : vector<2x32xf32>
    %286 = arith.mulf %281, %285 : vector<2x32xf32>
    %cst_91 = arith.constant dense<0.000000e+00> : vector<2x128xf32>
    %287 = tpu.matmul %286, %7, %cst_91 {dimension_numbers = #tpu.dot_dimension_numbers<[1], [0], [0], [1], [0, 0, 1, 1], [], []>} : vector<2x32xf32>, vector<32x128xf32>, vector<2x128xf32> -> vector<2x128xf32>
    %288 = vector.extract_strided_slice %5 {offsets = [10, 0], sizes = [2, 128], strides = [1, 1]} : vector<16x128xf32> to vector<2x128xf32>
    %cst_92 = arith.constant dense<0.000000e+00> : vector<2x128xf32>
    %289 = tpu.matmul %260, %6, %cst_92 {dimension_numbers = #tpu.dot_dimension_numbers<[1], [0], [0], [1], [0, 0, 1, 1], [], []>} : vector<2x32xf32>, vector<32x128xf32>, vector<2x128xf32> -> vector<2x128xf32>
    %290 = arith.addf %288, %289 : vector<2x128xf32>
    %291 = arith.mulf %290, %20 : vector<2x128xf32>
    %292 = math.tanh %291 : vector<2x128xf32>
    %293 = vector.extract_strided_slice %292 {offsets = [0, 0], sizes = [2, 32], strides = [1, 1]} : vector<2x128xf32> to vector<2x32xf32>
    %cst_93 = arith.constant 5.000000e-01 : f32
    %294 = vector.broadcast %cst_93 : f32 to vector<2x32xf32>
    %295 = arith.mulf %294, %293 : vector<2x32xf32>
    %cst_94 = arith.constant 5.000000e-01 : f32
    %296 = vector.broadcast %cst_94 : f32 to vector<2x32xf32>
    %297 = arith.addf %295, %296 : vector<2x32xf32>
    %298 = vector.extract_strided_slice %292 {offsets = [0, 32], sizes = [2, 32], strides = [1, 1]} : vector<2x128xf32> to vector<2x32xf32>
    %cst_95 = arith.constant 5.000000e-01 : f32
    %299 = vector.broadcast %cst_95 : f32 to vector<2x32xf32>
    %300 = arith.mulf %299, %298 : vector<2x32xf32>
    %cst_96 = arith.constant 5.000000e-01 : f32
    %301 = vector.broadcast %cst_96 : f32 to vector<2x32xf32>
    %302 = arith.addf %300, %301 : vector<2x32xf32>
    %303 = vector.extract_strided_slice %292 {offsets = [0, 64], sizes = [2, 32], strides = [1, 1]} : vector<2x128xf32> to vector<2x32xf32>
    %304 = vector.extract_strided_slice %292 {offsets = [0, 96], sizes = [2, 32], strides = [1, 1]} : vector<2x128xf32> to vector<2x32xf32>
    %cst_97 = arith.constant 5.000000e-01 : f32
    %305 = vector.broadcast %cst_97 : f32 to vector<2x32xf32>
    %306 = arith.mulf %305, %304 : vector<2x32xf32>
    %cst_98 = arith.constant 5.000000e-01 : f32
    %307 = vector.broadcast %cst_98 : f32 to vector<2x32xf32>
    %308 = arith.addf %306, %307 : vector<2x32xf32>
    %309 = arith.mulf %302, %258 : vector<2x32xf32>
    %310 = arith.mulf %297, %303 : vector<2x32xf32>
    %311 = arith.addf %309, %310 : vector<2x32xf32>
    %312 = math.tanh %311 : vector<2x32xf32>
    %313 = arith.mulf %308, %312 : vector<2x32xf32>
    %cst_99 = arith.constant dense<0.000000e+00> : vector<2x128xf32>
    %314 = tpu.matmul %313, %8, %cst_99 {dimension_numbers = #tpu.dot_dimension_numbers<[1], [0], [0], [1], [0, 0, 1, 1], [], []>} : vector<2x32xf32>, vector<32x128xf32>, vector<2x128xf32> -> vector<2x128xf32>
    %315 = arith.addf %287, %314 : vector<2x128xf32>
    %316 = arith.addf %315, %11 : vector<2x128xf32>
    %317 = arith.mulf %316, %20 : vector<2x128xf32>
    %318 = math.tanh %317 : vector<2x128xf32>
    %319 = vector.extract_strided_slice %318 {offsets = [0, 0], sizes = [2, 32], strides = [1, 1]} : vector<2x128xf32> to vector<2x32xf32>
    %cst_100 = arith.constant 5.000000e-01 : f32
    %320 = vector.broadcast %cst_100 : f32 to vector<2x32xf32>
    %321 = arith.mulf %320, %319 : vector<2x32xf32>
    %cst_101 = arith.constant 5.000000e-01 : f32
    %322 = vector.broadcast %cst_101 : f32 to vector<2x32xf32>
    %323 = arith.addf %321, %322 : vector<2x32xf32>
    %324 = vector.extract_strided_slice %318 {offsets = [0, 32], sizes = [2, 32], strides = [1, 1]} : vector<2x128xf32> to vector<2x32xf32>
    %cst_102 = arith.constant 5.000000e-01 : f32
    %325 = vector.broadcast %cst_102 : f32 to vector<2x32xf32>
    %326 = arith.mulf %325, %324 : vector<2x32xf32>
    %cst_103 = arith.constant 5.000000e-01 : f32
    %327 = vector.broadcast %cst_103 : f32 to vector<2x32xf32>
    %328 = arith.addf %326, %327 : vector<2x32xf32>
    %329 = vector.extract_strided_slice %318 {offsets = [0, 64], sizes = [2, 32], strides = [1, 1]} : vector<2x128xf32> to vector<2x32xf32>
    %330 = vector.extract_strided_slice %318 {offsets = [0, 96], sizes = [2, 32], strides = [1, 1]} : vector<2x128xf32> to vector<2x32xf32>
    %cst_104 = arith.constant 5.000000e-01 : f32
    %331 = vector.broadcast %cst_104 : f32 to vector<2x32xf32>
    %332 = arith.mulf %331, %330 : vector<2x32xf32>
    %cst_105 = arith.constant 5.000000e-01 : f32
    %333 = vector.broadcast %cst_105 : f32 to vector<2x32xf32>
    %334 = arith.addf %332, %333 : vector<2x32xf32>
    %335 = arith.mulf %328, %284 : vector<2x32xf32>
    %336 = arith.mulf %323, %329 : vector<2x32xf32>
    %337 = arith.addf %335, %336 : vector<2x32xf32>
    %338 = math.tanh %337 : vector<2x32xf32>
    %339 = arith.mulf %334, %338 : vector<2x32xf32>
    %cst_106 = arith.constant dense<0.000000e+00> : vector<2x128xf32>
    %340 = tpu.matmul %339, %7, %cst_106 {dimension_numbers = #tpu.dot_dimension_numbers<[1], [0], [0], [1], [0, 0, 1, 1], [], []>} : vector<2x32xf32>, vector<32x128xf32>, vector<2x128xf32> -> vector<2x128xf32>
    %341 = vector.extract_strided_slice %5 {offsets = [12, 0], sizes = [2, 128], strides = [1, 1]} : vector<16x128xf32> to vector<2x128xf32>
    %cst_107 = arith.constant dense<0.000000e+00> : vector<2x128xf32>
    %342 = tpu.matmul %313, %6, %cst_107 {dimension_numbers = #tpu.dot_dimension_numbers<[1], [0], [0], [1], [0, 0, 1, 1], [], []>} : vector<2x32xf32>, vector<32x128xf32>, vector<2x128xf32> -> vector<2x128xf32>
    %343 = arith.addf %341, %342 : vector<2x128xf32>
    %344 = arith.mulf %343, %20 : vector<2x128xf32>
    %345 = math.tanh %344 : vector<2x128xf32>
    %346 = vector.extract_strided_slice %345 {offsets = [0, 0], sizes = [2, 32], strides = [1, 1]} : vector<2x128xf32> to vector<2x32xf32>
    %cst_108 = arith.constant 5.000000e-01 : f32
    %347 = vector.broadcast %cst_108 : f32 to vector<2x32xf32>
    %348 = arith.mulf %347, %346 : vector<2x32xf32>
    %cst_109 = arith.constant 5.000000e-01 : f32
    %349 = vector.broadcast %cst_109 : f32 to vector<2x32xf32>
    %350 = arith.addf %348, %349 : vector<2x32xf32>
    %351 = vector.extract_strided_slice %345 {offsets = [0, 32], sizes = [2, 32], strides = [1, 1]} : vector<2x128xf32> to vector<2x32xf32>
    %cst_110 = arith.constant 5.000000e-01 : f32
    %352 = vector.broadcast %cst_110 : f32 to vector<2x32xf32>
    %353 = arith.mulf %352, %351 : vector<2x32xf32>
    %cst_111 = arith.constant 5.000000e-01 : f32
    %354 = vector.broadcast %cst_111 : f32 to vector<2x32xf32>
    %355 = arith.addf %353, %354 : vector<2x32xf32>
    %356 = vector.extract_strided_slice %345 {offsets = [0, 64], sizes = [2, 32], strides = [1, 1]} : vector<2x128xf32> to vector<2x32xf32>
    %357 = vector.extract_strided_slice %345 {offsets = [0, 96], sizes = [2, 32], strides = [1, 1]} : vector<2x128xf32> to vector<2x32xf32>
    %cst_112 = arith.constant 5.000000e-01 : f32
    %358 = vector.broadcast %cst_112 : f32 to vector<2x32xf32>
    %359 = arith.mulf %358, %357 : vector<2x32xf32>
    %cst_113 = arith.constant 5.000000e-01 : f32
    %360 = vector.broadcast %cst_113 : f32 to vector<2x32xf32>
    %361 = arith.addf %359, %360 : vector<2x32xf32>
    %362 = arith.mulf %355, %311 : vector<2x32xf32>
    %363 = arith.mulf %350, %356 : vector<2x32xf32>
    %364 = arith.addf %362, %363 : vector<2x32xf32>
    %365 = math.tanh %364 : vector<2x32xf32>
    %366 = arith.mulf %361, %365 : vector<2x32xf32>
    %cst_114 = arith.constant dense<0.000000e+00> : vector<2x128xf32>
    %367 = tpu.matmul %366, %8, %cst_114 {dimension_numbers = #tpu.dot_dimension_numbers<[1], [0], [0], [1], [0, 0, 1, 1], [], []>} : vector<2x32xf32>, vector<32x128xf32>, vector<2x128xf32> -> vector<2x128xf32>
    %368 = arith.addf %340, %367 : vector<2x128xf32>
    %369 = arith.addf %368, %11 : vector<2x128xf32>
    %370 = arith.mulf %369, %20 : vector<2x128xf32>
    %371 = math.tanh %370 : vector<2x128xf32>
    %372 = vector.extract_strided_slice %371 {offsets = [0, 0], sizes = [2, 32], strides = [1, 1]} : vector<2x128xf32> to vector<2x32xf32>
    %cst_115 = arith.constant 5.000000e-01 : f32
    %373 = vector.broadcast %cst_115 : f32 to vector<2x32xf32>
    %374 = arith.mulf %373, %372 : vector<2x32xf32>
    %cst_116 = arith.constant 5.000000e-01 : f32
    %375 = vector.broadcast %cst_116 : f32 to vector<2x32xf32>
    %376 = arith.addf %374, %375 : vector<2x32xf32>
    %377 = vector.extract_strided_slice %371 {offsets = [0, 32], sizes = [2, 32], strides = [1, 1]} : vector<2x128xf32> to vector<2x32xf32>
    %cst_117 = arith.constant 5.000000e-01 : f32
    %378 = vector.broadcast %cst_117 : f32 to vector<2x32xf32>
    %379 = arith.mulf %378, %377 : vector<2x32xf32>
    %cst_118 = arith.constant 5.000000e-01 : f32
    %380 = vector.broadcast %cst_118 : f32 to vector<2x32xf32>
    %381 = arith.addf %379, %380 : vector<2x32xf32>
    %382 = vector.extract_strided_slice %371 {offsets = [0, 64], sizes = [2, 32], strides = [1, 1]} : vector<2x128xf32> to vector<2x32xf32>
    %383 = vector.extract_strided_slice %371 {offsets = [0, 96], sizes = [2, 32], strides = [1, 1]} : vector<2x128xf32> to vector<2x32xf32>
    %cst_119 = arith.constant 5.000000e-01 : f32
    %384 = vector.broadcast %cst_119 : f32 to vector<2x32xf32>
    %385 = arith.mulf %384, %383 : vector<2x32xf32>
    %cst_120 = arith.constant 5.000000e-01 : f32
    %386 = vector.broadcast %cst_120 : f32 to vector<2x32xf32>
    %387 = arith.addf %385, %386 : vector<2x32xf32>
    %388 = arith.mulf %381, %337 : vector<2x32xf32>
    %389 = arith.mulf %376, %382 : vector<2x32xf32>
    %390 = arith.addf %388, %389 : vector<2x32xf32>
    %391 = math.tanh %390 : vector<2x32xf32>
    %392 = arith.mulf %387, %391 : vector<2x32xf32>
    %cst_121 = arith.constant dense<0.000000e+00> : vector<2x128xf32>
    %393 = tpu.matmul %392, %7, %cst_121 {dimension_numbers = #tpu.dot_dimension_numbers<[1], [0], [0], [1], [0, 0, 1, 1], [], []>} : vector<2x32xf32>, vector<32x128xf32>, vector<2x128xf32> -> vector<2x128xf32>
    %394 = vector.extract_strided_slice %5 {offsets = [14, 0], sizes = [2, 128], strides = [1, 1]} : vector<16x128xf32> to vector<2x128xf32>
    %cst_122 = arith.constant dense<0.000000e+00> : vector<2x128xf32>
    %395 = tpu.matmul %366, %6, %cst_122 {dimension_numbers = #tpu.dot_dimension_numbers<[1], [0], [0], [1], [0, 0, 1, 1], [], []>} : vector<2x32xf32>, vector<32x128xf32>, vector<2x128xf32> -> vector<2x128xf32>
    %396 = arith.addf %394, %395 : vector<2x128xf32>
    %397 = arith.mulf %396, %20 : vector<2x128xf32>
    %398 = math.tanh %397 : vector<2x128xf32>
    %399 = vector.extract_strided_slice %398 {offsets = [0, 0], sizes = [2, 32], strides = [1, 1]} : vector<2x128xf32> to vector<2x32xf32>
    %cst_123 = arith.constant 5.000000e-01 : f32
    %400 = vector.broadcast %cst_123 : f32 to vector<2x32xf32>
    %401 = arith.mulf %400, %399 : vector<2x32xf32>
    %cst_124 = arith.constant 5.000000e-01 : f32
    %402 = vector.broadcast %cst_124 : f32 to vector<2x32xf32>
    %403 = arith.addf %401, %402 : vector<2x32xf32>
    %404 = vector.extract_strided_slice %398 {offsets = [0, 32], sizes = [2, 32], strides = [1, 1]} : vector<2x128xf32> to vector<2x32xf32>
    %cst_125 = arith.constant 5.000000e-01 : f32
    %405 = vector.broadcast %cst_125 : f32 to vector<2x32xf32>
    %406 = arith.mulf %405, %404 : vector<2x32xf32>
    %cst_126 = arith.constant 5.000000e-01 : f32
    %407 = vector.broadcast %cst_126 : f32 to vector<2x32xf32>
    %408 = arith.addf %406, %407 : vector<2x32xf32>
    %409 = vector.extract_strided_slice %398 {offsets = [0, 64], sizes = [2, 32], strides = [1, 1]} : vector<2x128xf32> to vector<2x32xf32>
    %410 = vector.extract_strided_slice %398 {offsets = [0, 96], sizes = [2, 32], strides = [1, 1]} : vector<2x128xf32> to vector<2x32xf32>
    %cst_127 = arith.constant 5.000000e-01 : f32
    %411 = vector.broadcast %cst_127 : f32 to vector<2x32xf32>
    %412 = arith.mulf %411, %410 : vector<2x32xf32>
    %cst_128 = arith.constant 5.000000e-01 : f32
    %413 = vector.broadcast %cst_128 : f32 to vector<2x32xf32>
    %414 = arith.addf %412, %413 : vector<2x32xf32>
    %415 = arith.mulf %408, %364 : vector<2x32xf32>
    %416 = arith.mulf %403, %409 : vector<2x32xf32>
    %417 = arith.addf %415, %416 : vector<2x32xf32>
    %418 = math.tanh %417 : vector<2x32xf32>
    %419 = arith.mulf %414, %418 : vector<2x32xf32>
    %cst_129 = arith.constant dense<0.000000e+00> : vector<2x128xf32>
    %420 = tpu.matmul %419, %8, %cst_129 {dimension_numbers = #tpu.dot_dimension_numbers<[1], [0], [0], [1], [0, 0, 1, 1], [], []>} : vector<2x32xf32>, vector<32x128xf32>, vector<2x128xf32> -> vector<2x128xf32>
    %421 = arith.addf %393, %420 : vector<2x128xf32>
    %422 = arith.addf %421, %11 : vector<2x128xf32>
    %423 = arith.mulf %422, %20 : vector<2x128xf32>
    %424 = math.tanh %423 : vector<2x128xf32>
    %425 = vector.extract_strided_slice %424 {offsets = [0, 0], sizes = [2, 32], strides = [1, 1]} : vector<2x128xf32> to vector<2x32xf32>
    %cst_130 = arith.constant 5.000000e-01 : f32
    %426 = vector.broadcast %cst_130 : f32 to vector<2x32xf32>
    %427 = arith.mulf %426, %425 : vector<2x32xf32>
    %cst_131 = arith.constant 5.000000e-01 : f32
    %428 = vector.broadcast %cst_131 : f32 to vector<2x32xf32>
    %429 = arith.addf %427, %428 : vector<2x32xf32>
    %430 = vector.extract_strided_slice %424 {offsets = [0, 32], sizes = [2, 32], strides = [1, 1]} : vector<2x128xf32> to vector<2x32xf32>
    %cst_132 = arith.constant 5.000000e-01 : f32
    %431 = vector.broadcast %cst_132 : f32 to vector<2x32xf32>
    %432 = arith.mulf %431, %430 : vector<2x32xf32>
    %cst_133 = arith.constant 5.000000e-01 : f32
    %433 = vector.broadcast %cst_133 : f32 to vector<2x32xf32>
    %434 = arith.addf %432, %433 : vector<2x32xf32>
    %435 = vector.extract_strided_slice %424 {offsets = [0, 64], sizes = [2, 32], strides = [1, 1]} : vector<2x128xf32> to vector<2x32xf32>
    %436 = vector.extract_strided_slice %424 {offsets = [0, 96], sizes = [2, 32], strides = [1, 1]} : vector<2x128xf32> to vector<2x32xf32>
    %cst_134 = arith.constant 5.000000e-01 : f32
    %437 = vector.broadcast %cst_134 : f32 to vector<2x32xf32>
    %438 = arith.mulf %437, %436 : vector<2x32xf32>
    %cst_135 = arith.constant 5.000000e-01 : f32
    %439 = vector.broadcast %cst_135 : f32 to vector<2x32xf32>
    %440 = arith.addf %438, %439 : vector<2x32xf32>
    %441 = arith.mulf %434, %390 : vector<2x32xf32>
    %442 = arith.mulf %429, %435 : vector<2x32xf32>
    %443 = arith.addf %441, %442 : vector<2x32xf32>
    %444 = math.tanh %443 : vector<2x32xf32>
    %445 = arith.mulf %440, %444 : vector<2x32xf32>
    %c0_136 = arith.constant 0 : index
    %c0_137 = arith.constant 0 : index
    %446 = vector.load %arg7[%c0_136, %c0_137] : memref<1x32xf32, #tpu.memory_space<vmem>>, vector<1x32xf32>
    %447 = vector.broadcast %446 : vector<1x32xf32> to vector<2x32xf32>
    %448 = arith.mulf %445, %447 : vector<2x32xf32>
    %cst_138 = arith.constant dense<0.000000e+00> : vector<2xf32>
    %449 = vector.multi_reduction <add>, %448, %cst_138 [1] : vector<2x32xf32> to vector<2xf32>
    %450 = vector.shape_cast %449 : vector<2xf32> to vector<2x1xf32>
    %c0_139 = arith.constant 0 : index
    %c0_140 = arith.constant 0 : index
    %451 = vector.load %arg8[%c0_139, %c0_140] : memref<1x1xf32, #tpu.memory_space<vmem>>, vector<1x1xf32>
    %452 = vector.broadcast %451 : vector<1x1xf32> to vector<2x1xf32>
    %453 = arith.addf %450, %452 : vector<2x1xf32>
    %c0_141 = arith.constant 0 : index
    %c0_142 = arith.constant 0 : index
    %454 = vector.load %arg9[%c0_141, %c0_142] : memref<2x1xf32, #tpu.memory_space<vmem>>, vector<2x1xf32>
    tpu.vector_store %arg9[%c0_141, %c0_142], %453 {strides = array<i32>} : memref<2x1xf32, #tpu.memory_space<vmem>>, vector<2x1xf32>,
    return
  }
}

</mosaic_0001>

<bundles_post_ra>
// kernel: lstm_model_forward.1
= control target key start
LH: loop header
LB: loop body
LE: loop exit
PB: predicated region body
PF: predicated region fallthrough
CT: control target
= control target key end

     0   :  { %s3498_s0 = inlined_call_operand.vmem [shape: f32[16,10], index: 0, kind: input, shape index: {}]   ;;  %s3499_s1 = inlined_call_operand.hbm [shape: f32[10,128], index: 1, kind: input, shape index: {}]   ;;  %s3500_s2 = inlined_call_operand.vmem [shape: f32[1,128], index: 2, kind: input, shape index: {}]   ;;  %s3501_s3 = inlined_call_operand.vmem [shape: f32[32,128], index: 3, kind: input, shape index: {}]   ;;  %s3502_s4 = inlined_call_operand.vmem [shape: f32[32,128], index: 4, kind: input, shape index: {}]   ;;  %s3503_s5 = inlined_call_operand.hbm [shape: f32[32,128], index: 5, kind: input, shape index: {}]   ;;  %s3504_s6 = inlined_call_operand.vmem [shape: f32[1,128], index: 6, kind: input, shape index: {}]   ;;  %s3505_s7 = inlined_call_operand.vmem [shape: f32[1,32], index: 7, kind: input, shape index: {}]   ;;  %s3506_s8 = inlined_call_operand.<no memory space> [shape: f32[1,1], index: 8, kind: input, shape index: {}]   ;;  %s3507_s9 = inlined_call_operand.vmem [shape: f32[2,1], index: 9, kind: output, shape index: {}]  }
   0x1   :  { %v14_v0 = vstv %s3506_s8 }
   0x2   :  { %15 = vst [vmem:[#allocation2] sm:$0x1] %v14_v0 }
   0x3   :  { %16 = vsyncpa [#allocation4], 0 }
   0x4   :  { %17 = vsyncpa [#allocation6], 0  ;;  %s2925_s11 = smov [#allocation3]  }
   0x5   :  { %s25_s12 = sshll.u32 %s2925_s11, 4  ;;  %s26_s12 = int_to_ptr.vmem [resolvable:$true] %s25_s12 }
   0x6   :  { %s2889_s13 = scalar_lea.vmem %s26_s12, 256  ;;  %p2894_p1 = scmp.lt.s32.totalorder %s26_s12, %s26_s12 }
   0x7   :  { %p2890_p0 = scmp.ne.s32.totalorder %s26_s12, %s2889_s13  ;;  %p2895_p2 = scmp.lt.s32.totalorder %s2889_s13, %s2889_s13 }
   0x9   :  { %p2896_p3 = por %p2895_p2, %p2894_p1 }
   0xb   :  { %p2897_p4 = pnand %p2896_p3, %p2890_p0 }
   0xd   :  { %2900 = shalt.err (!%p2897_p4)
}
   0xe   :  { %s2926_s14 = smov 128   ;;  %s2927_s15 = smov 8  }
   0xf   :  { %31 = dma.hbm_to_vmem [thread:$0]  %s3499_s1, 256, %s26_s12, [#allocation4], %s2926_s14, %s2926_s14, %s2927_s15  }
  0x10   :  { %s2928_s8 = smov [#allocation5]  }
  0x11   :  { %s43_s18 = sshll.u32 %s2928_s8, 4  ;;  %s44_s18 = int_to_ptr.vmem [resolvable:$true] %s43_s18 }
  0x12   :  { %s2909_s19 = scalar_lea.vmem %s44_s18, 512  ;;  %p2914_p6 = scmp.lt.s32.totalorder %s44_s18, %s44_s18 }
  0x13   :  { %p2910_p5 = scmp.ne.s32.totalorder %s44_s18, %s2909_s19  ;;  %p2915_p7 = scmp.lt.s32.totalorder %s2909_s19, %s2909_s19 }
  0x15   :  { %p2916_p8 = por %p2915_p7, %p2914_p6 }
  0x17   :  { %p2917_p9 = pnand %p2916_p8, %p2910_p5 }
  0x19   :  { %2920 = shalt.err (!%p2917_p9)
}
  0x1a   :  { %49 = dma.hbm_to_vmem [thread:$0]  %s3503_s5, 512, %s44_s18, [#allocation6], %s2926_s14, %s2926_s14, %s2927_s15  }
  0x1b   :  { %2921 = dma.done.wait [#allocation4], 256  }
  0x1c   :  { %2922 = vsyncadd [#allocation4], 4294967040 }
  0x1d   :  { %2923 = dma.done.wait [#allocation6], 512  }
  0x1e   :  { %2924 = vsyncadd [#allocation6], 4294966784  ;;  %v2929_v1 = vmov 0.0   ;;  %vm2930_vm0 = vmmov 0   ;;  %vm80_vm1 = vcmask 1041408   ;;  %v3000_v3 = vld [vmem:[%s3501_s3 + $0x18] sm:$0xff]  ;;  %v178_v10 = vlaneseq }
  0x1f   :  { %2534 = vmatprep.subr.mxu1 %v2929_v1  ;;  %2542 = vmatprep.mubr.msk.f32.mxu1 %vm2930_vm0, %v2929_v1  ;;  %v65_v2 = vld [vmem:[#allocation3 + $0x8] sm:$0x3]  ;;  %v64_v4 = vld [vmem:[#allocation3] sm:$0xff]  ;;  %v3006_v5 = vld [vmem:[%s3501_s3 + $0x10] sm:$0xff]  ;;  %vm73_vm2 = vcmask 80896   ;;  %v2931_v17 = vmov 0.5  }
  0x20   :  { %2527 = vmatprep.subr.msk.mxu0 %vm80_vm1, %v65_v2  ;;  %2535 = vmatpush3.msra.mxu1 %v3000_v3  ;;  %v62_v6 = vld [vmem:[%s3498_s0] sm:$0xff]  ;;  %v63_v7 = vld [vmem:[%s3498_s0 + $0x8] sm:$0xff]  ;;  %v179_v11 = vand.u32 127, %v178_v10  ;;  %s2933_s12 = smov 32   ;;  %v3058_v32 = vld [vmem:[%s3502_s4 + $0x18] sm:$0xff]  ;;  %vm184_vm6 = vcmask 261120  }
  0x21   :  { %2528 = vmatpush3.msk.msra.mxu0 %vm80_vm1, %v65_v2  ;;  %2536 = vmatprep.subr.mxu1 %v2929_v1  ;;  %v3019_v8 = vld [vmem:[%s3501_s3 + $0x8] sm:$0xff]  ;;  %v3025_v9 = vld [vmem:[%s3501_s3] sm:$0xff]  ;;  %v3067_v34 = vld [vmem:[%s3502_s4 + $0x10] sm:$0xff]  ;;  %s2934_s17 = smov 96   ;;  %vm2354_vm7 = vcmask 254976   ;;  %vm2366_vm8 = vcmask 1024  }
  0x22   :  { %2529 = vmatprep.subr.mxu0 %v64_v4  ;;  %2537 = vmatpush3.msra.mxu1 %v3006_v5  ;;  %v2374_v12 = vld [vmem:[%s3500_s2] ss:$0 sm:$0xff]  ;;  %vm180_vm3 = vcmp.ge.s32.totalorder %v179_v11, 64  ;;  %vm181_vm4 = vcmp.lt.s32.totalorder %v179_v11, 96  ;;  %s2932_s2 = smov 64   ;;  %v3053_v31 = vld [vmem:[#allocation5 + $0x18] sm:$0xff] }
  0x23   :  { %2530 = vmatpush3.msra.mxu0 %v64_v4  ;;  %2531 = vmatprep.mubr.msk.f32.mxu0 %vm73_vm2, %v62_v6  ;;  %vm182_vm5 = vmand %vm180_vm3, %vm181_vm4  ;;  %v3060_v33 = vld [vmem:[#allocation5 + $0x10] sm:$0xff]  ;;  %v3071_v35 = vld [vmem:[#allocation5 + $0x8] sm:$0xff] }
  0x24   :  { %2538 = vmatprep.subr.mxu1 %v2929_v1  ;;  %2532 = vmatmul.mubr.msk.f32.vlgmr.msra.gmra.mxu0 %vm73_vm2, %v63_v7  ;;  %v3044_v18 = vsel %vm182_vm5, 1.0, %v2931_v17  ;;  %v3076_v36 = vld [vmem:[%s3502_s4 + $0x8] sm:$0xff]  ;;  %v3082_v37 = vld [vmem:[#allocation5] sm:$0xff]  ;;  %v3087_v38 = vld [vmem:[%s3502_s4] sm:$0xff] }
  0x25   :  { %2539 = vmatpush3.msra.mxu1 %v3019_v8  ;;  %2545 = vmatprep.subr.mxu0 %v2929_v1  ;;  %v3135_v46 = vld [vmem:[%s3504_s6] ss:$0 sm:$0xff] }
  0x26   :  { %2540 = vmatprep.subr.mxu1 %v2929_v1  ;;  %2553 = vmatprep.mubr.msk.f32.mxu0 %vm2930_vm0, %v2929_v1 }
  0x27   :  { %2541 = vmatpush3.msra.mxu1 %v3025_v9  ;;  %2546 = vmatpush3.msra.mxu0 %v3053_v31 }
  0x28   :  { %2543 = vmatmul.mubr.f32.vlgmr.msra.gmra.mxu1 %v2929_v1  ;;  %2556 = vmatprep.subr.mxu1 %v2929_v1 }
  0x29   :  { %2564 = vmatprep.mubr.msk.f32.mxu1 %vm2930_vm0, %v2929_v1  ;;  %2557 = vmatpush3.msra.mxu1 %v3058_v32 }
  0x2a   :  { %2547 = vmatprep.subr.mxu0 %v2929_v1  ;;  %2558 = vmatprep.subr.mxu1 %v2929_v1 }
  0x2b   :  { %2548 = vmatpush3.msra.mxu0 %v3060_v33  ;;  %2559 = vmatpush3.msra.mxu1 %v3067_v34 }
  0x2c   :  { %2549 = vmatprep.subr.mxu0 %v2929_v1  ;;  %2560 = vmatprep.subr.mxu1 %v2929_v1 }
  0x2d   :  { %2550 = vmatpush3.msra.mxu0 %v3071_v35  ;;  %2561 = vmatpush3.msra.mxu1 %v3076_v36 }
  0x2e   :  { %2551 = vmatprep.subr.mxu0 %v2929_v1  ;;  %2562 = vmatprep.subr.mxu1 %v2929_v1 }
  0x2f   :  { %2552 = vmatpush3.msra.mxu0 %v3082_v37  ;;  %2563 = vmatpush3.msra.mxu1 %v3087_v38 }
  0x30   :  { %2567 = vmatprep.subr.mxu0 %v2929_v1  ;;  %2565 = vmatmul.mubr.f32.vlgmr.msra.gmra.mxu1 %v2929_v1 }
  0x31   :  { %2578 = vmatprep.subr.mxu1 %v2929_v1  ;;  %2586 = vmatprep.mubr.msk.f32.mxu1 %vm2930_vm0, %v2929_v1 }
  0x32   :  { %2579 = vmatpush3.msra.mxu1 %v3053_v31 }
  0x33   :  { %2580 = vmatprep.subr.mxu1 %v2929_v1 }
  0x34   :  { %2581 = vmatpush3.msra.mxu1 %v3060_v33 }
  0x35   :  { %2582 = vmatprep.subr.mxu1 %v2929_v1 }
  0x36   :  { %2583 = vmatpush3.msra.mxu1 %v3071_v35 }
  0x37   :  { %2584 = vmatprep.subr.mxu1 %v2929_v1 }
  0x38   :  { %2585 = vmatpush3.msra.mxu1 %v3082_v37 }
  0x39   :  { %2600 = vmatprep.subr.mxu1 %v2929_v1 }
  0xe4   :  { %v2533_v13 = vpop.f32.mrf.mxu0 }
  0xe5   :  { %v3040_v14 = vadd.f32 %v2533_v13, %v2374_v12 }
  0xe6   :  { %v150_v15 = vpop.f32.mrf.mxu0 }
  0xe7   :  { %v3042_v16 = vadd.f32 %v2374_v12, %v150_v15 }
  0xe8   :  { %v254_v19 = vpop.f32.mrf.mxu1 }
  0xe9   :  { %v258_v20 = vadd.f32 %v254_v19, %v3042_v16 }
  0xea   :  { %v2544_v21 = vpop.f32.mrf.mxu1 }
  0xeb   :  { %v259_v22 = vmul.f32 %v258_v20, %v3044_v18 }
  0xed   :  { %2808 = vtanh.f32 %v259_v22 }
  0xf0   :  { %v421_v43 = vpop.f32.mrf.mxu1 }
  0xf2   :  { %v2566_v44 = vpop.f32.mrf.mxu1 }
  0xfa   :  { %v2809_v23 = vpop.eup %2808 }
  0xfb   :  { %265 = vrot.lane.b32.xlu0 %v2809_v23, %s2932_s2  ;;  %v261_v24 = vmul.f32 0.5, %v2809_v23 }
  0xfd   :  { %v262_v25 = vadd.f32 0.5, %v261_v24 }
  0xff   :  { %v263_v28 = vmul.f32 0.0, %v262_v25 }
 0x16d   :  { %v266_v26 = vpop.permute.xlu0 %265 }
 0x16e   :  { %v268_v27 = vmul.f32 %v266_v26, %v262_v25 }
 0x170   :  { %270 = vrot.lane.b32.xlu0 %v268_v27, %s2933_s12 }
 0x1e2   :  { %v271_v29 = vpop.permute.xlu0 %270 }
 0x1e3   :  { %v3050_v30 = vadd.f32 %v271_v29, %v263_v28 }
 0x1e5   :  { %2810 = vtanh.f32 %v3050_v30  ;;  %v526_v10 = vrot.slane %v3050_v30, 6 }
 0x1f2   :  { %v2811_v39 = vpop.eup %2810 }
 0x1f3   :  { %276 = vrot.lane.b32.xlu1 %v2811_v39, %s2932_s2 }
 0x265   :  { %v277_v40 = vpop.permute.xlu1 %276 }
 0x266   :  { %v279_v41 = vmul.f32 %v277_v40, %v262_v25 }
 0x268   :  { %281 = vrot.lane.b32.xlu1 %v279_v41, %s2933_s12 }
 0x2da   :  { %v282_v42 = vpop.permute.xlu1 %281 }
 0x2db   :  { %2554 = vmatmul.mubr.msk.f32.vlgmr.msra.gmra.mxu0 %vm184_vm6, %v282_v42 }
 0x2dc   :  { %2568 = vmatpush3.msra.mxu0 %v3000_v3  ;;  %2575 = vmatprep.mubr.msk.f32.mxu0 %vm2930_vm0, %v2929_v1 }
 0x2dd   :  { %2569 = vmatprep.subr.mxu0 %v2929_v1 }
 0x2de   :  { %2570 = vmatpush3.msra.mxu0 %v3006_v5 }
 0x2df   :  { %2571 = vmatprep.subr.mxu0 %v2929_v1 }
 0x2e0   :  { %2572 = vmatpush3.msra.mxu0 %v3019_v8 }
 0x2e1   :  { %2573 = vmatprep.subr.mxu0 %v2929_v1 }
 0x2e2   :  { %2574 = vmatpush3.msra.mxu0 %v3025_v9 }
 0x2e3   :  { %2576 = vmatmul.mubr.msk.f32.vlgmr.msra.gmra.mxu0 %vm184_vm6, %v282_v42  ;;  %2589 = vmatprep.subr.mxu0 %v2929_v1 }
 0x2e4   :  { %2590 = vmatpush3.msra.mxu0 %v3058_v32  ;;  %2597 = vmatprep.mubr.msk.f32.mxu0 %vm2930_vm0, %v2929_v1 }
 0x2e5   :  { %2591 = vmatprep.subr.mxu0 %v2929_v1 }
 0x2e6   :  { %2592 = vmatpush3.msra.mxu0 %v3067_v34 }
 0x2e7   :  { %2593 = vmatprep.subr.mxu0 %v2929_v1 }
 0x2e8   :  { %2594 = vmatpush3.msra.mxu0 %v3076_v36 }
 0x2e9   :  { %2595 = vmatprep.subr.mxu0 %v2929_v1 }
 0x2ea   :  { %2596 = vmatpush3.msra.mxu0 %v3087_v38 }
 0x2eb   :  { %2611 = vmatprep.subr.mxu0 %v2929_v1 }
 0x39b   :  { %v351_v45 = vpop.f32.mrf.mxu0 }
 0x39c   :  { %v422_v47 = vadd.f32 %v421_v43, %v351_v45 }
 0x39d   :  { %v2555_v48 = vpop.f32.mrf.mxu0 }
 0x39e   :  { %v425_v49 = vadd.f32 %v3135_v46, %v422_v47 }
 0x3a0   :  { %v426_v50 = vmul.f32 %v425_v49, %v3044_v18 }
 0x3a2   :  { %2812 = vtanh.f32 %v426_v50 }
 0x3a3   :  { %v513_v51 = vpop.f32.mrf.mxu0 }
 0x3a4   :  { %v518_v52 = vrot.slane %v513_v51, 6 }
 0x3a5   :  { %v2577_v53 = vpop.f32.mrf.mxu0 }
 0x3a6   :  { %v520_v54 = vadd.f32 %v518_v52, %v3042_v16 }
 0x3a8   :  { %v521_v55 = vmul.f32 %v520_v54, %v3044_v18 }
 0x3aa   :  { %2814 = vtanh.f32 %v521_v55 }
 0x3af   :  { %v2813_v56 = vpop.eup %2812 }
 0x3b0   :  { %432 = vrot.lane.b32.xlu1 %v2813_v56, %s2932_s2  ;;  %v428_v58 = vmul.f32 0.5, %v2813_v56 }
 0x3b2   :  { %v429_v59 = vadd.f32 0.5, %v428_v58 }
 0x3b4   :  { %v430_v4 = vmul.f32 0.0, %v429_v59 }
 0x3b7   :  { %v2815_v57 = vpop.eup %2814 }
 0x3b8   :  { %530 = vrot.lane.b32.xlu0 %v2815_v57, %s2932_s2  ;;  %v523_v62 = vmul.f32 0.5, %v2815_v57 }
 0x3ba   :  { %v524_v63 = vadd.f32 0.5, %v523_v62 }
 0x3bc   :  { %v528_v11 = vmul.f32 %v526_v10, %v524_v63 }
 0x422   :  { %v433_v60 = vpop.permute.xlu1 %432 }
 0x423   :  { %v435_v61 = vmul.f32 %v433_v60, %v429_v59 }
 0x425   :  { %437 = vrot.lane.b32.xlu1 %v435_v61, %s2933_s12 }
 0x42a   :  { %v531_v0 = vpop.permute.xlu0 %530 }
 0x42b   :  { %v533_v2 = vmul.f32 %v531_v0, %v524_v63 }
 0x42d   :  { %535 = vrot.lane.b32.xlu0 %v533_v2, %s2933_s12 }
 0x497   :  { %v438_v6 = vpop.permute.xlu1 %437 }
 0x498   :  { %v3145_v7 = vadd.f32 %v438_v6, %v430_v4 }
 0x49a   :  { %2816 = vtanh.f32 %v3145_v7 }
 0x49f   :  { %v536_v12 = vpop.permute.xlu0 %535 }
 0x4a0   :  { %v3149_v13 = vadd.f32 %v536_v12, %v528_v11 }
 0x4a2   :  { %2818 = vtanh.f32 %v3149_v13  ;;  %v797_v60 = vrot.slane %v3149_v13, 6 }
 0x4a7   :  { %v2817_v15 = vpop.eup %2816 }
 0x4a8   :  { %443 = vrot.lane.b32.xlu1 %v2817_v15, %s2932_s2 }
 0x4af   :  { %v2819_v17 = vpop.eup %2818 }
 0x4b0   :  { %541 = vrot.lane.b32.xlu0 %v2819_v17, %s2932_s2 }
 0x51a   :  { %v444_v19 = vpop.permute.xlu1 %443 }
 0x51b   :  { %v446_v20 = vmul.f32 %v444_v19, %v429_v59 }
 0x51d   :  { %622 = vrot.lane.b32.xlu1 %v446_v20, %s2933_s12 }
 0x522   :  { %v542_v21 = vpop.permute.xlu0 %541 }
 0x523   :  { %v544_v22 = vmul.f32 %v542_v21, %v524_v63 }
 0x525   :  { %v546_v23 = vrot.slane %v544_v22, 2 }
 0x527   :  { %547 = vrot.lane.b32.xlu0 %v546_v23, %s2933_s12 }
 0x58f   :  { %v623_v24 = vpop.permute.xlu1 %622 }
 0x590   :  { %2598 = vmatmul.mubr.msk.f32.vlgmr.msra.gmra.mxu0 %vm184_vm6, %v623_v24 }
 0x591   :  { %2612 = vmatpush3.msra.mxu0 %v3053_v31  ;;  %2619 = vmatprep.mubr.msk.f32.mxu0 %vm2930_vm0, %v2929_v1 }
 0x592   :  { %2613 = vmatprep.subr.mxu0 %v2929_v1 }
 0x593   :  { %2614 = vmatpush3.msra.mxu0 %v3060_v33 }
 0x594   :  { %2615 = vmatprep.subr.mxu0 %v2929_v1 }
 0x595   :  { %2616 = vmatpush3.msra.mxu0 %v3071_v35 }
 0x596   :  { %2617 = vmatprep.subr.mxu0 %v2929_v1 }
 0x597   :  { %2618 = vmatpush3.msra.mxu0 %v3082_v37 }
 0x598   :  { %2633 = vmatprep.subr.mxu0 %v2929_v1 }
 0x599   :  { %v548_v25 = vpop.permute.xlu0 %547 }
 0x59a   :  { %2587 = vmatmul.mubr.msk.f32.vlgmr.msra.gmra.mxu1 %vm184_vm6, %v548_v25 }
 0x59b   :  { %2601 = vmatpush3.msra.mxu1 %v3000_v3  ;;  %2608 = vmatprep.mubr.msk.f32.mxu1 %vm2930_vm0, %v2929_v1 }
 0x59c   :  { %2602 = vmatprep.subr.mxu1 %v2929_v1 }
 0x59d   :  { %2603 = vmatpush3.msra.mxu1 %v3006_v5 }
 0x59e   :  { %2604 = vmatprep.subr.mxu1 %v2929_v1 }
 0x59f   :  { %2605 = vmatpush3.msra.mxu1 %v3019_v8 }
 0x5a0   :  { %2606 = vmatprep.subr.mxu1 %v2929_v1 }
 0x5a1   :  { %2607 = vmatpush3.msra.mxu1 %v3025_v9 }
 0x5a2   :  { %2609 = vmatmul.mubr.msk.f32.vlgmr.msra.gmra.mxu1 %vm184_vm6, %v548_v25  ;;  %2622 = vmatprep.subr.mxu1 %v2929_v1 }
 0x5a3   :  { %2623 = vmatpush3.msra.mxu1 %v3058_v32  ;;  %2630 = vmatprep.mubr.msk.f32.mxu1 %vm2930_vm0, %v2929_v1 }
 0x5a4   :  { %2624 = vmatprep.subr.mxu1 %v2929_v1 }
 0x5a5   :  { %2625 = vmatpush3.msra.mxu1 %v3067_v34 }
 0x5a6   :  { %2626 = vmatprep.subr.mxu1 %v2929_v1 }
 0x5a7   :  { %2627 = vmatpush3.msra.mxu1 %v3076_v36 }
 0x5a8   :  { %2628 = vmatprep.subr.mxu1 %v2929_v1 }
 0x5a9   :  { %2629 = vmatpush3.msra.mxu1 %v3087_v38 }
 0x5aa   :  { %2644 = vmatprep.subr.mxu1 %v2929_v1 }
 0x650   :  { %v692_v26 = vpop.f32.mrf.mxu0 }
 0x652   :  { %v2599_v27 = vpop.f32.mrf.mxu0 }
 0x65a   :  { %v617_v28 = vpop.f32.mrf.mxu1 }
 0x65b   :  { %v693_v29 = vadd.f32 %v692_v26, %v617_v28 }
 0x65c   :  { %v2588_v30 = vpop.f32.mrf.mxu1 }
 0x65d   :  { %v696_v39 = vadd.f32 %v3135_v46, %v693_v29 }
 0x65f   :  { %v697_v40 = vmul.f32 %v696_v39, %v3044_v18 }
 0x661   :  { %2820 = vtanh.f32 %v697_v40 }
 0x662   :  { %v784_v41 = vpop.f32.mrf.mxu1 }
 0x663   :  { %v789_v42 = vrot.slane %v784_v41, 4 }
 0x664   :  { %v2610_v43 = vpop.f32.mrf.mxu1 }
 0x665   :  { %v791_v44 = vadd.f32 %v789_v42, %v3042_v16 }
 0x667   :  { %v792_v45 = vmul.f32 %v791_v44, %v3044_v18 }
 0x669   :  { %2822 = vtanh.f32 %v792_v45 }
 0x66e   :  { %v2821_v47 = vpop.eup %2820 }
 0x66f   :  { %703 = vrot.lane.b32.xlu1 %v2821_v47, %s2932_s2  ;;  %v699_v49 = vmul.f32 0.5, %v2821_v47 }
 0x671   :  { %v700_v50 = vadd.f32 0.5, %v699_v49 }
 0x673   :  { %v701_v57 = vmul.f32 %v700_v50, %v3145_v7 }
 0x676   :  { %v2823_v48 = vpop.eup %2822 }
 0x677   :  { %801 = vrot.lane.b32.xlu0 %v2823_v48, %s2932_s2  ;;  %v794_v53 = vmul.f32 0.5, %v2823_v48 }
 0x679   :  { %v795_v54 = vadd.f32 0.5, %v794_v53 }
 0x67b   :  { %v799_v61 = vmul.f32 %v797_v60, %v795_v54 }
 0x6e1   :  { %v704_v51 = vpop.permute.xlu1 %703 }
 0x6e2   :  { %v706_v52 = vmul.f32 %v704_v51, %v700_v50 }
 0x6e4   :  { %708 = vrot.lane.b32.xlu1 %v706_v52, %s2933_s12 }
 0x6e9   :  { %v802_v55 = vpop.permute.xlu0 %801 }
 0x6ea   :  { %v804_v56 = vmul.f32 %v802_v55, %v795_v54 }
 0x6ec   :  { %806 = vrot.lane.b32.xlu0 %v804_v56, %s2933_s12 }
 0x756   :  { %v709_v58 = vpop.permute.xlu1 %708 }
 0x757   :  { %v3198_v59 = vadd.f32 %v709_v58, %v701_v57 }
 0x759   :  { %2824 = vtanh.f32 %v3198_v59 }
 0x75e   :  { %v807_v62 = vpop.permute.xlu0 %806 }
 0x75f   :  { %v3202_v63 = vadd.f32 %v807_v62, %v799_v61 }
 0x761   :  { %2826 = vtanh.f32 %v3202_v63 }
 0x766   :  { %v2825_v0 = vpop.eup %2824 }
 0x767   :  { %714 = vrot.lane.b32.xlu1 %v2825_v0, %s2932_s2 }
 0x76e   :  { %v2827_v2 = vpop.eup %2826 }
 0x76f   :  { %812 = vrot.lane.b32.xlu0 %v2827_v2, %s2932_s2 }
 0x7d9   :  { %v715_v4 = vpop.permute.xlu1 %714 }
 0x7da   :  { %v717_v6 = vmul.f32 %v715_v4, %v700_v50  ;;  %v1068_v50 = vrot.slane %v3202_v63, 6 }
 0x7dc   :  { %893 = vrot.lane.b32.xlu1 %v717_v6, %s2933_s12 }
 0x7e1   :  { %v813_v7 = vpop.permute.xlu0 %812 }
 0x7e2   :  { %v815_v10 = vmul.f32 %v813_v7, %v795_v54 }
 0x7e4   :  { %v817_v11 = vrot.slane %v815_v10, 4 }
 0x7e6   :  { %818 = vrot.lane.b32.xlu0 %v817_v11, %s2933_s12 }
 0x84e   :  { %v894_v12 = vpop.permute.xlu1 %893 }
 0x84f   :  { %2631 = vmatmul.mubr.msk.f32.vlgmr.msra.gmra.mxu1 %vm184_vm6, %v894_v12 }
 0x850   :  { %2645 = vmatpush3.msra.mxu1 %v3053_v31  ;;  %2652 = vmatprep.mubr.msk.f32.mxu1 %vm2930_vm0, %v2929_v1 }
 0x851   :  { %2646 = vmatprep.subr.mxu1 %v2929_v1 }
 0x852   :  { %2647 = vmatpush3.msra.mxu1 %v3060_v33 }
 0x853   :  { %2648 = vmatprep.subr.mxu1 %v2929_v1 }
 0x854   :  { %2649 = vmatpush3.msra.mxu1 %v3071_v35 }
 0x855   :  { %2650 = vmatprep.subr.mxu1 %v2929_v1 }
 0x856   :  { %2651 = vmatpush3.msra.mxu1 %v3082_v37 }
 0x857   :  { %2666 = vmatprep.subr.mxu1 %v2929_v1 }
 0x858   :  { %v819_v13 = vpop.permute.xlu0 %818 }
 0x859   :  { %2620 = vmatmul.mubr.msk.f32.vlgmr.msra.gmra.mxu0 %vm184_vm6, %v819_v13 }
 0x85a   :  { %2634 = vmatpush3.msra.mxu0 %v3000_v3  ;;  %2641 = vmatprep.mubr.msk.f32.mxu0 %vm2930_vm0, %v2929_v1 }
 0x85b   :  { %2635 = vmatprep.subr.mxu0 %v2929_v1 }
 0x85c   :  { %2636 = vmatpush3.msra.mxu0 %v3006_v5 }
 0x85d   :  { %2637 = vmatprep.subr.mxu0 %v2929_v1 }
 0x85e   :  { %2638 = vmatpush3.msra.mxu0 %v3019_v8 }
 0x85f   :  { %2639 = vmatprep.subr.mxu0 %v2929_v1 }
 0x860   :  { %2640 = vmatpush3.msra.mxu0 %v3025_v9 }
 0x861   :  { %2642 = vmatmul.mubr.msk.f32.vlgmr.msra.gmra.mxu0 %vm184_vm6, %v819_v13  ;;  %2655 = vmatprep.subr.mxu0 %v2929_v1 }
 0x862   :  { %2656 = vmatpush3.msra.mxu0 %v3058_v32  ;;  %2663 = vmatprep.mubr.msk.f32.mxu0 %vm2930_vm0, %v2929_v1 }
 0x863   :  { %2657 = vmatprep.subr.mxu0 %v2929_v1 }
 0x864   :  { %2658 = vmatpush3.msra.mxu0 %v3067_v34 }
 0x865   :  { %2659 = vmatprep.subr.mxu0 %v2929_v1 }
 0x866   :  { %2660 = vmatpush3.msra.mxu0 %v3076_v36 }
 0x867   :  { %2661 = vmatprep.subr.mxu0 %v2929_v1 }
 0x868   :  { %2662 = vmatpush3.msra.mxu0 %v3087_v38 }
 0x869   :  { %2677 = vmatprep.subr.mxu0 %v2929_v1 }
 0x90f   :  { %v963_v15 = vpop.f32.mrf.mxu1 }
 0x911   :  { %v2632_v17 = vpop.f32.mrf.mxu1 }
 0x919   :  { %v888_v19 = vpop.f32.mrf.mxu0 }
 0x91a   :  { %v964_v20 = vadd.f32 %v963_v15, %v888_v19 }
 0x91b   :  { %v2621_v21 = vpop.f32.mrf.mxu0 }
 0x91c   :  { %v967_v22 = vadd.f32 %v3135_v46, %v964_v20 }
 0x91e   :  { %v968_v23 = vmul.f32 %v967_v22, %v3044_v18 }
 0x920   :  { %2828 = vtanh.f32 %v968_v23 }
 0x921   :  { %v1055_v24 = vpop.f32.mrf.mxu0 }
 0x922   :  { %v1060_v25 = vrot.slane %v1055_v24, 2 }
 0x923   :  { %v2643_v26 = vpop.f32.mrf.mxu0 }
 0x924   :  { %v1062_v27 = vadd.f32 %v1060_v25, %v3042_v16 }
 0x926   :  { %v1063_v28 = vmul.f32 %v1062_v27, %v3044_v18 }
 0x928   :  { %2830 = vtanh.f32 %v1063_v28 }
 0x92d   :  { %v2829_v29 = vpop.eup %2828 }
 0x92e   :  { %974 = vrot.lane.b32.xlu1 %v2829_v29, %s2932_s2  ;;  %v970_v39 = vmul.f32 0.5, %v2829_v29 }
 0x930   :  { %v971_v40 = vadd.f32 0.5, %v970_v39 }
 0x932   :  { %v972_v16 = vmul.f32 %v971_v40, %v3198_v59 }
 0x935   :  { %v2831_v30 = vpop.eup %2830 }
 0x936   :  { %1072 = vrot.lane.b32.xlu0 %v2831_v30, %s2932_s2  ;;  %v1065_v43 = vmul.f32 0.5, %v2831_v30 }
 0x938   :  { %v1066_v44 = vadd.f32 0.5, %v1065_v43 }
 0x93a   :  { %v1070_v51 = vmul.f32 %v1068_v50, %v1066_v44 }
 0x9a0   :  { %v975_v41 = vpop.permute.xlu1 %974 }
 0x9a1   :  { %v977_v42 = vmul.f32 %v975_v41, %v971_v40 }
 0x9a3   :  { %979 = vrot.lane.b32.xlu1 %v977_v42, %s2933_s12 }
 0x9a8   :  { %v1073_v45 = vpop.permute.xlu0 %1072 }
 0x9a9   :  { %v1075_v47 = vmul.f32 %v1073_v45, %v1066_v44 }
 0x9ab   :  { %1077 = vrot.lane.b32.xlu0 %v1075_v47, %s2933_s12 }
 0xa15   :  { %v980_v48 = vpop.permute.xlu1 %979 }
 0xa16   :  { %v3251_v49 = vadd.f32 %v980_v48, %v972_v16 }
 0xa18   :  { %2832 = vtanh.f32 %v3251_v49 }
 0xa1d   :  { %v1078_v52 = vpop.permute.xlu0 %1077 }
 0xa1e   :  { %v3255_v53 = vadd.f32 %v1078_v52, %v1070_v51 }
 0xa20   :  { %2834 = vtanh.f32 %v3255_v53  ;;  %v1336_v39 = vrot.slane %v3255_v53, 6 }
 0xa25   :  { %v2833_v54 = vpop.eup %2832 }
 0xa26   :  { %985 = vrot.lane.b32.xlu1 %v2833_v54, %s2932_s2 }
 0xa2d   :  { %v2835_v55 = vpop.eup %2834 }
 0xa2e   :  { %1083 = vrot.lane.b32.xlu0 %v2835_v55, %s2932_s2 }
 0xa98   :  { %v986_v56 = vpop.permute.xlu1 %985 }
 0xa99   :  { %v988_v57 = vmul.f32 %v986_v56, %v971_v40 }
 0xa9b   :  { %1164 = vrot.lane.b32.xlu1 %v988_v57, %s2933_s12 }
 0xaa0   :  { %v1084_v58 = vpop.permute.xlu0 %1083 }
 0xaa1   :  { %v1086_v59 = vmul.f32 %v1084_v58, %v1066_v44 }
 0xaa3   :  { %v1088_v60 = vrot.slane %v1086_v59, 6 }
 0xaa5   :  { %1089 = vrot.lane.b32.xlu0 %v1088_v60, %s2933_s12 }
 0xb0d   :  { %v1165_v61 = vpop.permute.xlu1 %1164 }
 0xb0e   :  { %2664 = vmatmul.mubr.msk.f32.vlgmr.msra.gmra.mxu0 %vm184_vm6, %v1165_v61 }
 0xb0f   :  { %2678 = vmatpush3.msra.mxu0 %v3053_v31  ;;  %2685 = vmatprep.mubr.msk.f32.mxu0 %vm2930_vm0, %v2929_v1 }
 0xb10   :  { %2679 = vmatprep.subr.mxu0 %v2929_v1 }
 0xb11   :  { %2680 = vmatpush3.msra.mxu0 %v3060_v33 }
 0xb12   :  { %2681 = vmatprep.subr.mxu0 %v2929_v1 }
 0xb13   :  { %2682 = vmatpush3.msra.mxu0 %v3071_v35 }
 0xb14   :  { %2683 = vmatprep.subr.mxu0 %v2929_v1 }
 0xb15   :  { %2684 = vmatpush3.msra.mxu0 %v3082_v37 }
 0xb16   :  { %2699 = vmatprep.subr.mxu0 %v2929_v1 }
 0xb17   :  { %v1090_v62 = vpop.permute.xlu0 %1089 }
 0xb18   :  { %2653 = vmatmul.mubr.msk.f32.vlgmr.msra.gmra.mxu1 %vm184_vm6, %v1090_v62 }
 0xb19   :  { %2667 = vmatpush3.msra.mxu1 %v3000_v3  ;;  %2674 = vmatprep.mubr.msk.f32.mxu1 %vm2930_vm0, %v2929_v1 }
 0xb1a   :  { %2668 = vmatprep.subr.mxu1 %v2929_v1 }
 0xb1b   :  { %2669 = vmatpush3.msra.mxu1 %v3006_v5 }
 0xb1c   :  { %2670 = vmatprep.subr.mxu1 %v2929_v1 }
 0xb1d   :  { %2671 = vmatpush3.msra.mxu1 %v3019_v8 }
 0xb1e   :  { %2672 = vmatprep.subr.mxu1 %v2929_v1 }
 0xb1f   :  { %2673 = vmatpush3.msra.mxu1 %v3025_v9 }
 0xb20   :  { %2675 = vmatmul.mubr.msk.f32.vlgmr.msra.gmra.mxu1 %vm184_vm6, %v1090_v62  ;;  %2688 = vmatprep.subr.mxu1 %v2929_v1 }
 0xb21   :  { %2689 = vmatpush3.msra.mxu1 %v3058_v32  ;;  %2696 = vmatprep.mubr.msk.f32.mxu1 %vm2930_vm0, %v2929_v1 }
 0xb22   :  { %2690 = vmatprep.subr.mxu1 %v2929_v1 }
 0xb23   :  { %2691 = vmatpush3.msra.mxu1 %v3067_v34 }
 0xb24   :  { %2692 = vmatprep.subr.mxu1 %v2929_v1 }
 0xb25   :  { %2693 = vmatpush3.msra.mxu1 %v3076_v36 }
 0xb26   :  { %2694 = vmatprep.subr.mxu1 %v2929_v1 }
 0xb27   :  { %2695 = vmatpush3.msra.mxu1 %v3087_v38 }
 0xb28   :  { %2710 = vmatprep.subr.mxu1 %v2929_v1 }
 0xbce   :  { %v1234_v63 = vpop.f32.mrf.mxu0 }
 0xbd0   :  { %v2665_v0 = vpop.f32.mrf.mxu0 }
 0xbd8   :  { %v1159_v2 = vpop.f32.mrf.mxu1 }
 0xbd9   :  { %v1235_v4 = vadd.f32 %v1234_v63, %v1159_v2 }
 0xbda   :  { %v2654_v6 = vpop.f32.mrf.mxu1 }
 0xbdb   :  { %v1238_v7 = vadd.f32 %v3135_v46, %v1235_v4 }
 0xbdd   :  { %v1239_v10 = vmul.f32 %v1238_v7, %v3044_v18 }
 0xbdf   :  { %2836 = vtanh.f32 %v1239_v10 }
 0xbe0   :  { %v1326_v11 = vpop.f32.mrf.mxu1 }
 0xbe1   :  { %v1330_v12 = vadd.f32 %v1326_v11, %v3040_v14 }
 0xbe2   :  { %v2676_v13 = vpop.f32.mrf.mxu1 }
 0xbe3   :  { %v1331_v15 = vmul.f32 %v1330_v12, %v3044_v18 }
 0xbe5   :  { %2838 = vtanh.f32 %v1331_v15 }
 0xbec   :  { %v2837_v17 = vpop.eup %2836 }
 0xbed   :  { %1245 = vrot.lane.b32.xlu1 %v2837_v17, %s2932_s2  ;;  %v1241_v20 = vmul.f32 0.5, %v2837_v17 }
 0xbef   :  { %v1242_v21 = vadd.f32 0.5, %v1241_v20 }
 0xbf1   :  { %v1243_v28 = vmul.f32 %v1242_v21, %v3251_v49 }
 0xbf2   :  { %v2839_v19 = vpop.eup %2838 }
 0xbf3   :  { %1340 = vrot.lane.b32.xlu0 %v2839_v19, %s2932_s2  ;;  %v1333_v24 = vmul.f32 0.5, %v2839_v19 }
 0xbf5   :  { %v1334_v25 = vadd.f32 0.5, %v1333_v24 }
 0xbf7   :  { %v1338_v40 = vmul.f32 %v1336_v39, %v1334_v25 }
 0xc5f   :  { %v1246_v22 = vpop.permute.xlu1 %1245 }
 0xc60   :  { %v1248_v23 = vmul.f32 %v1246_v22, %v1242_v21 }
 0xc62   :  { %1250 = vrot.lane.b32.xlu1 %v1248_v23, %s2933_s12 }
 0xc65   :  { %v1341_v26 = vpop.permute.xlu0 %1340 }
 0xc66   :  { %v1343_v27 = vmul.f32 %v1341_v26, %v1334_v25 }
 0xc68   :  { %1345 = vrot.lane.b32.xlu0 %v1343_v27, %s2933_s12 }
 0xcd4   :  { %v1251_v29 = vpop.permute.xlu1 %1250 }
 0xcd5   :  { %v3304_v30 = vadd.f32 %v1251_v29, %v1243_v28 }
 0xcd7   :  { %2840 = vtanh.f32 %v3304_v30 }
 0xcda   :  { %v1346_v41 = vpop.permute.xlu0 %1345 }
 0xcdb   :  { %v3308_v42 = vadd.f32 %v1346_v41, %v1338_v40 }
 0xcdd   :  { %2842 = vtanh.f32 %v3308_v42  ;;  %v1606_v20 = vrot.slane %v3308_v42, 6 }
 0xce4   :  { %v2841_v43 = vpop.eup %2840 }
 0xce5   :  { %1256 = vrot.lane.b32.xlu1 %v2841_v43, %s2932_s2 }
 0xcea   :  { %v2843_v44 = vpop.eup %2842 }
 0xceb   :  { %1351 = vrot.lane.b32.xlu0 %v2843_v44, %s2932_s2 }
 0xd57   :  { %v1257_v45 = vpop.permute.xlu1 %1256 }
 0xd58   :  { %v1259_v47 = vmul.f32 %v1257_v45, %v1242_v21 }
 0xd5a   :  { %1431 = vrot.lane.b32.xlu1 %v1259_v47, %s2933_s12 }
 0xd5d   :  { %v1352_v16 = vpop.permute.xlu0 %1351 }
 0xd5e   :  { %v1354_v48 = vmul.f32 %v1352_v16, %v1334_v25 }
 0xd60   :  { %1356 = vrot.lane.b32.xlu0 %v1354_v48, %s2933_s12 }
 0xdcc   :  { %v1432_v49 = vpop.permute.xlu1 %1431 }
 0xdcd   :  { %2697 = vmatmul.mubr.msk.f32.vlgmr.msra.gmra.mxu1 %vm184_vm6, %v1432_v49 }
 0xdce   :  { %2711 = vmatpush3.msra.mxu1 %v3053_v31  ;;  %2718 = vmatprep.mubr.msk.f32.mxu1 %vm2930_vm0, %v2929_v1 }
 0xdcf   :  { %2712 = vmatprep.subr.mxu1 %v2929_v1 }
 0xdd0   :  { %2713 = vmatpush3.msra.mxu1 %v3060_v33 }
 0xdd1   :  { %2714 = vmatprep.subr.mxu1 %v2929_v1 }
 0xdd2   :  { %v1357_v50 = vpop.permute.xlu0 %1356  ;;  %2715 = vmatpush3.msra.mxu1 %v3071_v35 }
 0xdd3   :  { %2686 = vmatmul.mubr.msk.f32.vlgmr.msra.gmra.mxu0 %vm184_vm6, %v1357_v50  ;;  %2716 = vmatprep.subr.mxu1 %v2929_v1 }
 0xdd4   :  { %2700 = vmatpush3.msra.mxu0 %v3000_v3  ;;  %2707 = vmatprep.mubr.msk.f32.mxu0 %vm2930_vm0, %v2929_v1 }
 0xdd5   :  { %2701 = vmatprep.subr.mxu0 %v2929_v1  ;;  %2717 = vmatpush3.msra.mxu1 %v3082_v37 }
 0xdd6   :  { %2702 = vmatpush3.msra.mxu0 %v3006_v5  ;;  %2732 = vmatprep.subr.mxu1 %v2929_v1 }
 0xdd7   :  { %2703 = vmatprep.subr.mxu0 %v2929_v1 }
 0xdd8   :  { %2704 = vmatpush3.msra.mxu0 %v3019_v8 }
 0xdd9   :  { %2705 = vmatprep.subr.mxu0 %v2929_v1 }
 0xdda   :  { %2706 = vmatpush3.msra.mxu0 %v3025_v9 }
 0xddb   :  { %2708 = vmatmul.mubr.msk.f32.vlgmr.msra.gmra.mxu0 %vm184_vm6, %v1357_v50  ;;  %2721 = vmatprep.subr.mxu0 %v2929_v1 }
 0xddc   :  { %2722 = vmatpush3.msra.mxu0 %v3058_v32  ;;  %2729 = vmatprep.mubr.msk.f32.mxu0 %vm2930_vm0, %v2929_v1 }
 0xddd   :  { %2723 = vmatprep.subr.mxu0 %v2929_v1 }
 0xdde   :  { %2724 = vmatpush3.msra.mxu0 %v3067_v34 }
 0xddf   :  { %2725 = vmatprep.subr.mxu0 %v2929_v1 }
 0xde0   :  { %2726 = vmatpush3.msra.mxu0 %v3076_v36 }
 0xde1   :  { %2727 = vmatprep.subr.mxu0 %v2929_v1 }
 0xde2   :  { %2728 = vmatpush3.msra.mxu0 %v3087_v38 }
 0xde3   :  { %2743 = vmatprep.subr.mxu0 %v2929_v1 }
 0xe8d   :  { %v1501_v51 = vpop.f32.mrf.mxu1 }
 0xe8f   :  { %v2698_v52 = vpop.f32.mrf.mxu1 }
 0xe93   :  { %v1426_v53 = vpop.f32.mrf.mxu0 }
 0xe94   :  { %v1502_v54 = vadd.f32 %v1501_v51, %v1426_v53 }
 0xe95   :  { %v2687_v55 = vpop.f32.mrf.mxu0 }
 0xe96   :  { %v1505_v56 = vadd.f32 %v3135_v46, %v1502_v54 }
 0xe98   :  { %v1506_v57 = vmul.f32 %v1505_v56, %v3044_v18 }
 0xe9a   :  { %2844 = vtanh.f32 %v1506_v57 }
 0xe9b   :  { %v1593_v58 = vpop.f32.mrf.mxu0 }
 0xe9c   :  { %v1598_v59 = vrot.slane %v1593_v58, 6 }
 0xe9d   :  { %v2709_v60 = vpop.f32.mrf.mxu0 }
 0xe9e   :  { %v1600_v61 = vadd.f32 %v1598_v59, %v3040_v14 }
 0xea0   :  { %v1601_v62 = vmul.f32 %v1600_v61, %v3044_v18 }
 0xea2   :  { %2846 = vtanh.f32 %v1601_v62 }
 0xea7   :  { %v2845_v63 = vpop.eup %2844 }
 0xea8   :  { %1512 = vrot.lane.b32.xlu1 %v2845_v63, %s2932_s2  ;;  %v1508_v2 = vmul.f32 0.5, %v2845_v63 }
 0xeaa   :  { %v1509_v4 = vadd.f32 0.5, %v1508_v2 }
 0xeac   :  { %v1510_v15 = vmul.f32 %v1509_v4, %v3304_v30 }
 0xeaf   :  { %v2847_v0 = vpop.eup %2846 }
 0xeb0   :  { %1610 = vrot.lane.b32.xlu0 %v2847_v0, %s2932_s2  ;;  %v1603_v10 = vmul.f32 0.5, %v2847_v0 }
 0xeb2   :  { %v1604_v11 = vadd.f32 0.5, %v1603_v10 }
 0xeb4   :  { %v1608_v21 = vmul.f32 %v1606_v20, %v1604_v11 }
 0xf1a   :  { %v1513_v6 = vpop.permute.xlu1 %1512 }
 0xf1b   :  { %v1515_v7 = vmul.f32 %v1513_v6, %v1509_v4 }
 0xf1d   :  { %1517 = vrot.lane.b32.xlu1 %v1515_v7, %s2933_s12 }
 0xf22   :  { %v1611_v12 = vpop.permute.xlu0 %1610 }
 0xf23   :  { %v1613_v13 = vmul.f32 %v1611_v12, %v1604_v11  ;;  %v2876_v12 = vld [vmem:[%s3502_s4 + $0x18] sm:$0xff] }
 0xf25   :  { %1615 = vrot.lane.b32.xlu0 %v1613_v13, %s2933_s12  ;;  %v2877_v13 = vld [vmem:[%s3502_s4 + $0x10] sm:$0xff] }
 0xf8f   :  { %v1518_v17 = vpop.permute.xlu1 %1517 }
 0xf90   :  { %v3357_v19 = vadd.f32 %v1518_v17, %v1510_v15  ;;  %v2878_v15 = vld [vmem:[%s3502_s4 + $0x8] sm:$0xff]  ;;  %v2879_v17 = vld [vmem:[%s3502_s4] sm:$0xff] }
 0xf92   :  { %2848 = vtanh.f32 %v3357_v19 }
 0xf97   :  { %v1616_v22 = vpop.permute.xlu0 %1615 }
 0xf98   :  { %v3361_v23 = vadd.f32 %v1616_v22, %v1608_v21 }
 0xf9a   :  { %2850 = vtanh.f32 %v3361_v23  ;;  %v1877_v58 = vrot.slane %v3361_v23, 6 }
 0xf9f   :  { %v2849_v24 = vpop.eup %2848 }
 0xfa0   :  { %1523 = vrot.lane.b32.xlu1 %v2849_v24, %s2932_s2 }
 0xfa7   :  { %v2851_v25 = vpop.eup %2850 }
 0xfa8   :  { %1621 = vrot.lane.b32.xlu0 %v2851_v25, %s2932_s2 }
0x1012   :  { %v1524_v26 = vpop.permute.xlu1 %1523 }
0x1013   :  { %v1526_v27 = vmul.f32 %v1524_v26, %v1509_v4 }
0x1015   :  { %1702 = vrot.lane.b32.xlu1 %v1526_v27, %s2933_s12 }
0x101a   :  { %v1622_v28 = vpop.permute.xlu0 %1621 }
0x101b   :  { %v1624_v29 = vmul.f32 %v1622_v28, %v1604_v11 }
0x101d   :  { %v1626_v30 = vrot.slane %v1624_v29, 2 }
0x101f   :  { %1627 = vrot.lane.b32.xlu0 %v1626_v30, %s2933_s12 }
0x1087   :  { %v1703_v39 = vpop.permute.xlu1 %1702 }
0x1088   :  { %2730 = vmatmul.mubr.msk.f32.vlgmr.msra.gmra.mxu0 %vm184_vm6, %v1703_v39 }
0x1089   :  { %2744 = vmatpush3.msra.mxu0 %v3053_v31  ;;  %2751 = vmatprep.mubr.msk.f32.mxu0 %vm2930_vm0, %v2929_v1 }
0x108a   :  { %2745 = vmatprep.subr.mxu0 %v2929_v1 }
0x108b   :  { %2746 = vmatpush3.msra.mxu0 %v3060_v33 }
0x108c   :  { %2747 = vmatprep.subr.mxu0 %v2929_v1 }
0x108d   :  { %2748 = vmatpush3.msra.mxu0 %v3071_v35 }
0x108e   :  { %2749 = vmatprep.subr.mxu0 %v2929_v1 }
0x108f   :  { %2750 = vmatpush3.msra.mxu0 %v3082_v37 }
0x1090   :  { %2765 = vmatprep.subr.mxu0 %v2929_v1 }
0x1091   :  { %v1628_v40 = vpop.permute.xlu0 %1627 }
0x1092   :  { %2719 = vmatmul.mubr.msk.f32.vlgmr.msra.gmra.mxu1 %vm184_vm6, %v1628_v40 }
0x1093   :  { %2733 = vmatpush3.msra.mxu1 %v3000_v3  ;;  %2740 = vmatprep.mubr.msk.f32.mxu1 %vm2930_vm0, %v2929_v1 }
0x1094   :  { %2734 = vmatprep.subr.mxu1 %v2929_v1 }
0x1095   :  { %2735 = vmatpush3.msra.mxu1 %v3006_v5 }
0x1096   :  { %2736 = vmatprep.subr.mxu1 %v2929_v1 }
0x1097   :  { %2737 = vmatpush3.msra.mxu1 %v3019_v8 }
0x1098   :  { %2738 = vmatprep.subr.mxu1 %v2929_v1 }
0x1099   :  { %2739 = vmatpush3.msra.mxu1 %v3025_v9 }
0x109a   :  { %2741 = vmatmul.mubr.msk.f32.vlgmr.msra.gmra.mxu1 %vm184_vm6, %v1628_v40  ;;  %2754 = vmatprep.subr.mxu1 %v2929_v1 }
0x109b   :  { %2755 = vmatpush3.msra.mxu1 %v3058_v32  ;;  %2762 = vmatprep.mubr.msk.f32.mxu1 %vm2930_vm0, %v2929_v1 }
0x109c   :  { %2756 = vmatprep.subr.mxu1 %v2929_v1 }
0x109d   :  { %2757 = vmatpush3.msra.mxu1 %v3067_v34 }
0x109e   :  { %2758 = vmatprep.subr.mxu1 %v2929_v1 }
0x109f   :  { %2759 = vmatpush3.msra.mxu1 %v3076_v36 }
0x10a0   :  { %2760 = vmatprep.subr.mxu1 %v2929_v1 }
0x10a1   :  { %2761 = vmatpush3.msra.mxu1 %v3087_v38 }
0x10a2   :  { %2776 = vmatprep.subr.mxu1 %v2929_v1 }
0x1148   :  { %v1772_v3 = vpop.f32.mrf.mxu0 }
0x114a   :  { %v2731_v5 = vpop.f32.mrf.mxu0 }
0x1152   :  { %v1697_v8 = vpop.f32.mrf.mxu1 }
0x1153   :  { %v1773_v9 = vadd.f32 %v1772_v3, %v1697_v8 }
0x1154   :  { %v2720_v32 = vpop.f32.mrf.mxu1 }
0x1155   :  { %v1776_v41 = vadd.f32 %v3135_v46, %v1773_v9 }
0x1157   :  { %v1777_v42 = vmul.f32 %v1776_v41, %v3044_v18 }
0x1159   :  { %2852 = vtanh.f32 %v1777_v42 }
0x115a   :  { %v1864_v34 = vpop.f32.mrf.mxu1 }
0x115b   :  { %v1869_v43 = vrot.slane %v1864_v34, 4 }
0x115c   :  { %v2742_v44 = vpop.f32.mrf.mxu1 }
0x115d   :  { %v1871_v36 = vadd.f32 %v1869_v43, %v3040_v14 }
0x115f   :  { %v1872_v45 = vmul.f32 %v1871_v36, %v3044_v18 }
0x1161   :  { %2854 = vtanh.f32 %v1872_v45 }
0x1166   :  { %v2853_v38 = vpop.eup %2852 }
0x1167   :  { %1783 = vrot.lane.b32.xlu1 %v2853_v38, %s2932_s2  ;;  %v1779_v16 = vmul.f32 0.5, %v2853_v38 }
0x1169   :  { %v1780_v48 = vadd.f32 0.5, %v1779_v16 }
0x116b   :  { %v1781_v55 = vmul.f32 %v1780_v48, %v3357_v19 }
0x116e   :  { %v2855_v47 = vpop.eup %2854 }
0x116f   :  { %1881 = vrot.lane.b32.xlu0 %v2855_v47, %s2932_s2  ;;  %v1874_v51 = vmul.f32 0.5, %v2855_v47 }
0x1171   :  { %v1875_v52 = vadd.f32 0.5, %v1874_v51 }
0x1173   :  { %v1879_v59 = vmul.f32 %v1877_v58, %v1875_v52 }
0x11d9   :  { %v1784_v49 = vpop.permute.xlu1 %1783 }
0x11da   :  { %v1786_v50 = vmul.f32 %v1784_v49, %v1780_v48 }
0x11dc   :  { %1788 = vrot.lane.b32.xlu1 %v1786_v50, %s2933_s12 }
0x11e1   :  { %v1882_v53 = vpop.permute.xlu0 %1881 }
0x11e2   :  { %v1884_v54 = vmul.f32 %v1882_v53, %v1875_v52 }
0x11e4   :  { %1886 = vrot.lane.b32.xlu0 %v1884_v54, %s2933_s12 }
0x124e   :  { %v1789_v56 = vpop.permute.xlu1 %1788 }
0x124f   :  { %v3410_v57 = vadd.f32 %v1789_v56, %v1781_v55 }
0x1251   :  { %2856 = vtanh.f32 %v3410_v57 }
0x1256   :  { %v1887_v60 = vpop.permute.xlu0 %1886 }
0x1257   :  { %v3414_v61 = vadd.f32 %v1887_v60, %v1879_v59  ;;  %v2880_v59 = vld [vmem:[%s3504_s6] ss:$0 sm:$0xff] }
0x1259   :  { %2858 = vtanh.f32 %v3414_v61  ;;  %v2148_v43 = vrot.slane %v3414_v61, 6 }
0x125e   :  { %v2857_v62 = vpop.eup %2856 }
0x125f   :  { %1794 = vrot.lane.b32.xlu1 %v2857_v62, %s2932_s2 }
0x1266   :  { %v2859_v63 = vpop.eup %2858 }
0x1267   :  { %1892 = vrot.lane.b32.xlu0 %v2859_v63, %s2932_s2 }
0x12d1   :  { %v1795_v0 = vpop.permute.xlu1 %1794 }
0x12d2   :  { %v1797_v2 = vmul.f32 %v1795_v0, %v1780_v48 }
0x12d4   :  { %1973 = vrot.lane.b32.xlu1 %v1797_v2, %s2933_s12 }
0x12d9   :  { %v1893_v4 = vpop.permute.xlu0 %1892 }
0x12da   :  { %v1895_v6 = vmul.f32 %v1893_v4, %v1875_v52 }
0x12dc   :  { %v1897_v7 = vrot.slane %v1895_v6, 4  ;;  %v2401_v6 = vld [vmem:[%s3505_s7] ss:$0 sm:$0xff] }
0x12de   :  { %1898 = vrot.lane.b32.xlu0 %v1897_v7, %s2933_s12 }
0x1346   :  { %v1974_v10 = vpop.permute.xlu1 %1973 }
0x1347   :  { %2763 = vmatmul.mubr.msk.f32.vlgmr.msra.gmra.mxu1 %vm184_vm6, %v1974_v10 }
0x1348   :  { %2777 = vmatpush3.msra.mxu1 %v3053_v31  ;;  %2784 = vmatprep.mubr.msk.f32.mxu1 %vm2930_vm0, %v2929_v1  ;;  %v2872_v31 = vld [vmem:[%s3501_s3 + $0x18] sm:$0xff] }
0x1349   :  { %2778 = vmatprep.subr.mxu1 %v2929_v1 }
0x134a   :  { %2779 = vmatpush3.msra.mxu1 %v3060_v33  ;;  %v2873_v33 = vld [vmem:[%s3501_s3 + $0x10] sm:$0xff] }
0x134b   :  { %2780 = vmatprep.subr.mxu1 %v2929_v1 }
0x134c   :  { %2781 = vmatpush3.msra.mxu1 %v3071_v35  ;;  %v2874_v35 = vld [vmem:[%s3501_s3 + $0x8] sm:$0xff] }
0x134d   :  { %2782 = vmatprep.subr.mxu1 %v2929_v1 }
0x134e   :  { %2783 = vmatpush3.msra.mxu1 %v3082_v37  ;;  %v2875_v37 = vld [vmem:[%s3501_s3] sm:$0xff] }
0x1350   :  { %v1899_v11 = vpop.permute.xlu0 %1898 }
0x1351   :  { %2752 = vmatmul.mubr.msk.f32.vlgmr.msra.gmra.mxu0 %vm184_vm6, %v1899_v11 }
0x1352   :  { %2766 = vmatpush3.msra.mxu0 %v2872_v31  ;;  %2773 = vmatprep.mubr.msk.f32.mxu0 %vm2930_vm0, %v2929_v1 }
0x1353   :  { %2767 = vmatprep.subr.mxu0 %v2929_v1 }
0x1354   :  { %2768 = vmatpush3.msra.mxu0 %v2873_v33 }
0x1355   :  { %2769 = vmatprep.subr.mxu0 %v2929_v1 }
0x1356   :  { %2770 = vmatpush3.msra.mxu0 %v2874_v35 }
0x1357   :  { %2771 = vmatprep.subr.mxu0 %v2929_v1 }
0x1358   :  { %2772 = vmatpush3.msra.mxu0 %v2875_v37 }
0x1359   :  { %2774 = vmatmul.mubr.msk.f32.vlgmr.msra.gmra.mxu0 %vm184_vm6, %v1899_v11  ;;  %2787 = vmatprep.subr.mxu0 %v2929_v1 }
0x135a   :  { %2788 = vmatpush3.msra.mxu0 %v2876_v12  ;;  %2795 = vmatprep.mubr.msk.f32.mxu0 %vm2930_vm0, %v2929_v1 }
0x135b   :  { %2789 = vmatprep.subr.mxu0 %v2929_v1 }
0x135c   :  { %2790 = vmatpush3.msra.mxu0 %v2877_v13 }
0x135d   :  { %2791 = vmatprep.subr.mxu0 %v2929_v1 }
0x135e   :  { %2792 = vmatpush3.msra.mxu0 %v2878_v15  ;;  %v2402_v15 = vld [vmem:[#allocation2] ss:$0 sm:$0xff] }
0x135f   :  { %2793 = vmatprep.subr.mxu0 %v2929_v1 }
0x1360   :  { %2794 = vmatpush3.msra.mxu0 %v2879_v17 }
0x1407   :  { %v2043_v19 = vpop.f32.mrf.mxu1 }
0x1409   :  { %v2764_v20 = vpop.f32.mrf.mxu1 }
0x1411   :  { %v1968_v21 = vpop.f32.mrf.mxu0 }
0x1412   :  { %v2044_v22 = vadd.f32 %v2043_v19, %v1968_v21 }
0x1413   :  { %v2753_v23 = vpop.f32.mrf.mxu0 }
0x1414   :  { %v2047_v24 = vadd.f32 %v3135_v46, %v2044_v22 }
0x1416   :  { %v2048_v25 = vmul.f32 %v2047_v24, %v3044_v18 }
0x1418   :  { %2860 = vtanh.f32 %v2048_v25 }
0x1419   :  { %v2135_v26 = vpop.f32.mrf.mxu0 }
0x141a   :  { %v2140_v27 = vrot.slane %v2135_v26, 2 }
0x141b   :  { %v2775_v28 = vpop.f32.mrf.mxu0 }
0x141c   :  { %v2142_v1 = vadd.f32 %v2140_v27, %v3040_v14 }
0x141e   :  { %v2143_v29 = vmul.f32 %v2142_v1, %v3044_v18 }
0x1420   :  { %2862 = vtanh.f32 %v2143_v29 }
0x1425   :  { %v2861_v30 = vpop.eup %2860 }
0x1426   :  { %2054 = vrot.lane.b32.xlu1 %v2861_v30, %s2932_s2  ;;  %v2050_v40 = vmul.f32 0.5, %v2861_v30 }
0x1428   :  { %v2051_v3 = vadd.f32 0.5, %v2050_v40 }
0x142a   :  { %v2052_v14 = vmul.f32 %v2051_v3, %v3410_v57 }
0x142d   :  { %v2863_v39 = vpop.eup %2862 }
0x142e   :  { %2152 = vrot.lane.b32.xlu0 %v2863_v39, %s2932_s2  ;;  %v2145_v8 = vmul.f32 0.5, %v2863_v39 }
0x1430   :  { %v2146_v9 = vadd.f32 0.5, %v2145_v8 }
0x1432   :  { %v2150_v44 = vmul.f32 %v2148_v43, %v2146_v9 }
0x1498   :  { %v2055_v46 = vpop.permute.xlu1 %2054 }
0x1499   :  { %v2057_v5 = vmul.f32 %v2055_v46, %v2051_v3 }
0x149b   :  { %2059 = vrot.lane.b32.xlu1 %v2057_v5, %s2933_s12 }
0x14a0   :  { %v2153_v32 = vpop.permute.xlu0 %2152 }
0x14a1   :  { %v2155_v41 = vmul.f32 %v2153_v32, %v2146_v9 }
0x14a3   :  { %2157 = vrot.lane.b32.xlu0 %v2155_v41, %s2933_s12 }
0x150d   :  { %v2060_v42 = vpop.permute.xlu1 %2059 }
0x150e   :  { %v2062_v34 = vadd.f32 %v2060_v42, %v2052_v14 }
0x1510   :  { %2864 = vtanh.f32 %v2062_v34 }
0x1515   :  { %v2158_v36 = vpop.permute.xlu0 %2157 }
0x1516   :  { %v2160_v45 = vadd.f32 %v2158_v36, %v2150_v44 }
0x1518   :  { %2866 = vtanh.f32 %v2160_v45 }
0x151d   :  { %v2865_v38 = vpop.eup %2864 }
0x151e   :  { %2065 = vrot.lane.b32.xlu1 %v2865_v38, %s2932_s2 }
0x1525   :  { %v2867_v47 = vpop.eup %2866 }
0x1526   :  { %2163 = vrot.lane.b32.xlu0 %v2867_v47, %s2932_s2 }
0x1590   :  { %v2066_v16 = vpop.permute.xlu1 %2065 }
0x1591   :  { %v2068_v48 = vmul.f32 %v2066_v16, %v2051_v3 }
0x1593   :  { %2244 = vrot.lane.b32.xlu1 %v2068_v48, %s2933_s12 }
0x1598   :  { %v2164_v49 = vpop.permute.xlu0 %2163 }
0x1599   :  { %v2166_v50 = vmul.f32 %v2164_v49, %v2146_v9 }
0x159b   :  { %v2168_v51 = vrot.slane %v2166_v50, 6 }
0x159d   :  { %2169 = vrot.lane.b32.xlu0 %v2168_v51, %s2933_s12 }
0x1605   :  { %v2245_v52 = vpop.permute.xlu1 %2244 }
0x1606   :  { %2796 = vmatmul.mubr.msk.f32.vlgmr.msra.gmra.mxu0 %vm184_vm6, %v2245_v52 }
0x160f   :  { %v2170_v53 = vpop.permute.xlu0 %2169 }
0x1610   :  { %2785 = vmatmul.mubr.msk.f32.vlgmr.msra.gmra.mxu1 %vm184_vm6, %v2170_v53 }
0x16c6   :  { %v2314_v54 = vpop.f32.mrf.mxu0 }
0x16c8   :  { %v2797_v55 = vpop.f32.mrf.mxu0 }
0x16d0   :  { %v2239_v56 = vpop.f32.mrf.mxu1 }
0x16d1   :  { %v2315_v57 = vadd.f32 %v2314_v54, %v2239_v56 }
0x16d2   :  { %v2786_v58 = vpop.f32.mrf.mxu1 }
0x16d3   :  { %v2318_v60 = vadd.f32 %v2880_v59, %v2315_v57 }
0x16d5   :  { %v2319_v61 = vmul.f32 %v2318_v60, %v3044_v18 }
0x16d7   :  { %2868 = vtanh.f32 %v2319_v61 }
0x16e4   :  { %v2869_v62 = vpop.eup %2868 }
0x16e5   :  { %2325 = vrot.lane.b32.xlu0 %v2869_v62, %s2932_s2  ;;  %v2321_v63 = vmul.f32 0.5, %v2869_v62 }
0x16e7   :  { %v2322_v0 = vadd.f32 0.5, %v2321_v63 }
0x16e9   :  { %v2323_v7 = vmul.f32 %v2322_v0, %v2062_v34 }
0x1757   :  { %v2326_v2 = vpop.permute.xlu0 %2325 }
0x1758   :  { %v2328_v4 = vmul.f32 %v2326_v2, %v2322_v0 }
0x175a   :  { %2330 = vrot.lane.b32.xlu1 %v2328_v4, %s2933_s12 }
0x175e   :  { %2346 = vrot.lane.b32.xlu1 %v2401_v6, %s2934_s17 }
0x17cc   :  { %v2331_v10 = vpop.permute.xlu1 %2330 }
0x17cd   :  { %v2333_v11 = vadd.f32 %v2331_v10, %v2323_v7 }
0x17cf   :  { %2870 = vtanh.f32 %v2333_v11 }
0x17d0   :  { %v2347_v33 = vpop.permute.xlu1 %2346 }
0x17dc   :  { %v2871_v18 = vpop.eup %2870 }
0x17dd   :  { %2336 = vrot.lane.b32.xlu0 %v2871_v18, %s2932_s2 }
0x184f   :  { %v2337_v31 = vpop.permute.xlu0 %2336 }
0x1850   :  { %v2339_v35 = vmul.f32 %v2337_v31, %v2322_v0 }
0x1852   :  { %v2349_v37 = vmul.f32 %v2347_v33, %v2339_v35 }
0x1854   :  { %2351 = vrot.lane.b32.xlu0 %v2349_v37, %s2933_s12 }
0x18c6   :  { %v2352_v12 = vpop.permute.xlu0 %2351 }
0x18c7   :  { %v2355_v13 = vsel %vm2354_vm7, %v2352_v12, 0.0 }
0x18c8   :  { %2356 = vadd.xlane.f32.xlu1 %v2355_v13 }
0x1951   :  { %v2357_v17 = vpop.xlane.xlu1 %2356 }
0x1952   :  { %v2365_v19 = vadd.f32 %v2402_v15, %v2357_v17 }
0x1954   :  { %2367 = vst.msk [vmem:[%s3507_s9] sm:$0x3] %vm2366_vm8, %v2365_v19 }
0x1955   :  { %2372 = vsyncpa [#allocation4], 1 }
0x1956   :  { %2373 = vsyncpa [#allocation6], 1 }

</bundles_post_ra>
